<compile_context>
chip_gen: v6e
topology: v6e:2x2x1
jax: 0.10.0
libtpu: 0.0.40
codegen_flags: <defaults>
</compile_context>

<pallas_src>
import functools

import jax
import jax.numpy as jnp
import numpy as np
from jax.experimental import pallas as pl
from jax.experimental.pallas import tpu as pltpu


def _lstm_classifier_kernel(x2d_ref, wih_ref, whh_ref, b_ref, wc_ref, bc_ref,
                            out_ref, gx_ref, *, B_pad, T, T_pad, Hp):
    """Single-invocation kernel: full LSTM recurrence + deferred classifier.

    x2d_ref: (T*B_pad, F)   time-major input (row index = t*B_pad + b), bf16
    wih_ref: (F, 4*Hp)      input->gates weight, transposed, gate-blocks padded
                            to Hp lanes, gate order (i, f, o, g), bf16
    whh_ref: (Hp, 4*Hp)     hidden->gates weight, transposed, padded, bf16
    b_ref  : (1, 4*Hp)      combined gate bias (b_ih + b_hh), padded, f32
    wc_ref : (1, Hp)        classifier weight, zero-padded beyond H, f32
    bc_ref : (1, 1)         classifier bias, f32
    out_ref: (B_pad, T_pad) sigmoid probabilities (valid region [:B, :T])
    gx_ref : (T*B_pad, 4*Hp) VMEM scratch holding the hoisted input projection
    """
    # ---- hoisted input projection: one MXU matmul, bias added once ----------
    gx_ref[...] = jnp.dot(x2d_ref[...], wih_ref[...],
                          preferred_element_type=jnp.float32) + b_ref[...]

    wc = wc_ref[...]                                        # (1, Hp) f32

    h = jnp.zeros((B_pad, Hp), jnp.float32)
    c = jnp.zeros((B_pad, Hp), jnp.float32)
    cols = []

    # Statically unrolled recurrence; h/c live in full (8,128) vregs.
    for t in range(T):
        # Contiguous, sublane-aligned block of time-t rows (time-major layout).
        gx_t = gx_ref[t * B_pad:(t + 1) * B_pad, :]         # (B_pad, 4*Hp)

        gates = gx_t + jnp.dot(h.astype(jnp.bfloat16), whh_ref[...],
                               preferred_element_type=jnp.float32)

        # Gate order (i, f, o, g); each gate is a lane-aligned Hp-wide slab,
        # so these slices are full-vreg selects (no lane rotates).
        sig = jax.nn.sigmoid(gates[:, :3 * Hp])
        i = sig[:, 0:Hp]
        f = sig[:, Hp:2 * Hp]
        o = sig[:, 2 * Hp:3 * Hp]
        g = jnp.tanh(gates[:, 3 * Hp:4 * Hp])

        c = f * c + i * g
        h = o * jnp.tanh(c)

        # Classifier dot product as a lane reduction; off the h/c dependency
        # chain, so the scheduler can hide it under the next step.
        cols.append(jnp.sum(h * wc, axis=-1, keepdims=True))   # (B_pad, 1)

    # ---- deferred classifier epilogue: one sigmoid, one lane-dense store ----
    logits = jnp.concatenate(cols, axis=1) + bc_ref[...]        # (B_pad, T)
    probs = jax.nn.sigmoid(logits)
    if T_pad > T:
        probs = jnp.concatenate(
            [probs, jnp.zeros((B_pad, T_pad - T), jnp.float32)], axis=1)
    out_ref[...] = probs                                        # (B_pad, T_pad)


def _pad_gate_blocks(w, H, Hp, axis=0):
    """PyTorch gate order (i, f, g, o) -> (i, f, o, g), each block padded H->Hp."""
    i, f, g, o = jnp.split(w, 4, axis=axis)
    pad_width = [(0, 0)] * w.ndim
    pad_width[axis] = (0, Hp - H)
    blocks = [jnp.pad(blk, pad_width) for blk in (i, f, o, g)]
    return jnp.concatenate(blocks, axis=axis)


@jax.jit
def lstm_classifier_forward(x, w_ih, w_hh, b_ih, b_hh, w_c, b_c):
    """Forward pass of LSTMClassifier.

    x    : (B, T, F) float32
    w_ih : (4H, F), w_hh: (4H, H), b_ih/b_hh: (4H,)   -- PyTorch LSTM params
    w_c  : (1, H), b_c: (1,)                          -- classifier (n_classes=1)
    returns (B, T) float32 probabilities
    """
    B, T, F = x.shape
    H = w_hh.shape[1]

    B_pad = ((B + 7) // 8) * 8          # full f32 sublane tile
    Hp = ((H + 127) // 128) * 128       # lane-aligned gate slabs
    T_pad = ((T + 127) // 128) * 128    # lane-dense output store

    # ---- one-off weight prep (reorder + pad + transpose + bf16 cast) --------
    wih_p = _pad_gate_blocks(w_ih, H, Hp, axis=0)                 # (4Hp, F)
    wih_t = jnp.transpose(wih_p).astype(jnp.bfloat16)             # (F, 4Hp)

    whh_p = _pad_gate_blocks(w_hh, H, Hp, axis=0)                 # (4Hp, H)
    whh_p = jnp.pad(whh_p, ((0, 0), (0, Hp - H)))                 # (4Hp, Hp)
    whh_t = jnp.transpose(whh_p).astype(jnp.bfloat16)             # (Hp, 4Hp)

    bias = _pad_gate_blocks(b_ih + b_hh, H, Hp, axis=0)
    bias = bias.reshape(1, 4 * Hp).astype(jnp.float32)            # (1, 4Hp)

    wc = jnp.pad(w_c, ((0, 0), (0, Hp - H))).astype(jnp.float32)  # (1, Hp)
    bc = b_c.reshape(1, 1).astype(jnp.float32)                    # (1, 1)

    # ---- time-major, batch-padded input: row index = t*B_pad + b ------------
    x_p = jnp.pad(x, ((0, B_pad - B), (0, 0), (0, 0)))            # (B_pad, T, F)
    x2d = jnp.transpose(x_p, (1, 0, 2)).reshape(T * B_pad, F)
    x2d = x2d.astype(jnp.bfloat16)                                # (T*B_pad, F)

    vmem = pl.BlockSpec(memory_space=pltpu.MemorySpace.VMEM)
    kernel = functools.partial(_lstm_classifier_kernel,
                               B_pad=B_pad, T=T, T_pad=T_pad, Hp=Hp)

    out_pad = pl.pallas_call(
        kernel,
        out_shape=jax.ShapeDtypeStruct((B_pad, T_pad), jnp.float32),
        in_specs=[vmem] * 6,
        out_specs=vmem,
        scratch_shapes=[pltpu.VMEM((T * B_pad, 4 * Hp), jnp.float32)],
        compiler_params=pltpu.CompilerParams(
            vmem_limit_bytes=32 * 1024 * 1024),
    )(x2d, wih_t, whh_t, bias, wc, bc)

    return out_pad[:B, :T]


def _reference_forward(x, w_ih, w_hh, b_ih, b_hh, w_c, b_c):
    """Pure-JAX f32 reference matching torch.nn.LSTM + Linear + Sigmoid."""
    B, T, F = x.shape
    H = w_hh.shape[1]
    wih_t = w_ih.T
    whh_t = w_hh.T
    b = (b_ih + b_hh)[None, :]
    wc_t = w_c.T
    bc = b_c[None, :]

    def step(carry, x_t):
        h, c = carry
        gates = x_t @ wih_t + h @ whh_t + b
        i = jax.nn.sigmoid(gates[:, 0:H])
        f = jax.nn.sigmoid(gates[:, H:2 * H])
        g = jnp.tanh(gates[:, 2 * H:3 * H])
        o = jax.nn.sigmoid(gates[:, 3 * H:4 * H])
        c = f * c + i * g
        h = o * jnp.tanh(c)
        y = jax.nn.sigmoid(h @ wc_t + bc)          # (B, 1)
        return (h, c), y[:, 0]

    init = (jnp.zeros((B, H), jnp.float32), jnp.zeros((B, H), jnp.float32))
    _, ys = jax.lax.scan(step, init, jnp.transpose(x, (1, 0, 2)))
    return ys.T                                    # (B, T)


if __name__ == "__main__":
    # Small shapes consistent with the module: LSTMClassifier(n_features, hidden, n_classes=1)
    B, T, F, H, C = 2, 8, 16, 32, 1

    key = jax.random.PRNGKey(0)
    keys = jax.random.split(key, 8)
    k = 1.0 / np.sqrt(H)  # PyTorch default uniform init bound

    w_ih = jax.random.uniform(keys[0], (4 * H, F), jnp.float32, -k, k)
    w_hh = jax.random.uniform(keys[1], (4 * H, H), jnp.float32, -k, k)
    b_ih = jax.random.uniform(keys[2], (4 * H,), jnp.float32, -k, k)
    b_hh = jax.random.uniform(keys[3], (4 * H,), jnp.float32, -k, k)
    w_c = jax.random.uniform(keys[4], (C, H), jnp.float32, -k, k)
    b_c = jax.random.uniform(keys[5], (C,), jnp.float32, -k, k)

    x = jax.random.normal(keys[6], (B, T, F), jnp.float32)

    # TODO(synk): fit/predict_proba/predict (BCELoss + RMSprop training loop) are
    # host-side training utilities, not part of the forward pass, and are not
    # implemented.

    out = lstm_classifier_forward(x, w_ih, w_hh, b_ih, b_hh, w_c, b_c)
    out = jax.block_until_ready(out)

    ref = _reference_forward(x, w_ih, w_hh, b_ih, b_hh, w_c, b_c)
    assert out.shape == (B, T), out.shape
    # bf16 MXU operands (f32 accumulation) -> relaxed tolerance vs f32 reference.
    np.testing.assert_allclose(np.asarray(out), np.asarray(ref), rtol=2e-2, atol=2e-2)

    print("KERNEL_OK")
</pallas_src>

<mosaic_0001>
module attributes {stable_mosaic.version = 11 : i64} {
  func.func @_lstm_classifier_kernel(%arg0: memref<64x16xbf16, #tpu.memory_space<vmem>>, %arg1: memref<16x512xbf16, #tpu.memory_space<vmem>>, %arg2: memref<128x512xbf16, #tpu.memory_space<vmem>>, %arg3: memref<1x512xf32, #tpu.memory_space<vmem>>, %arg4: memref<1x128xf32, #tpu.memory_space<vmem>>, %arg5: memref<1x1xf32, #tpu.memory_space<vmem>>, %arg6: memref<8x128xf32, #tpu.memory_space<vmem>>, %arg7: memref<64x512xf32, #tpu.memory_space<vmem>>) attributes {dimension_semantics = [], scalar_prefetch = 0 : i64, scratch_operands = 1 : i64, tpu.core_type = #tpu.core_type<tc>} {
    %c0 = arith.constant 0 : index
    %c0_0 = arith.constant 0 : index
    %0 = vector.load %arg0[%c0, %c0_0] : memref<64x16xbf16, #tpu.memory_space<vmem>>, vector<64x16xbf16>
    %c0_1 = arith.constant 0 : index
    %c0_2 = arith.constant 0 : index
    %1 = vector.load %arg1[%c0_1, %c0_2] : memref<16x512xbf16, #tpu.memory_space<vmem>>, vector<16x512xbf16>
    %cst = arith.constant dense<0.000000e+00> : vector<64x512xf32>
    %2 = tpu.matmul %0, %1, %cst {dimension_numbers = #tpu.dot_dimension_numbers<[1], [0], [0], [1], [0, 0, 1, 1], [], []>} : vector<64x16xbf16>, vector<16x512xbf16>, vector<64x512xf32> -> vector<64x512xf32>
    %c0_3 = arith.constant 0 : index
    %c0_4 = arith.constant 0 : index
    %3 = vector.load %arg3[%c0_3, %c0_4] : memref<1x512xf32, #tpu.memory_space<vmem>>, vector<1x512xf32>
    %4 = vector.broadcast %3 : vector<1x512xf32> to vector<64x512xf32>
    %5 = arith.addf %2, %4 : vector<64x512xf32>
    %c0_5 = arith.constant 0 : index
    %c0_6 = arith.constant 0 : index
    %6 = vector.load %arg7[%c0_5, %c0_6] : memref<64x512xf32, #tpu.memory_space<vmem>>, vector<64x512xf32>
    tpu.vector_store %arg7[%c0_5, %c0_6], %5 {strides = array<i32>} : memref<64x512xf32, #tpu.memory_space<vmem>>, vector<64x512xf32>,
    %c0_7 = arith.constant 0 : index
    %c0_8 = arith.constant 0 : index
    %7 = vector.load %arg4[%c0_7, %c0_8] : memref<1x128xf32, #tpu.memory_space<vmem>>, vector<1x128xf32>
    %cst_9 = arith.constant 0.000000e+00 : f32
    %8 = vector.broadcast %cst_9 : f32 to vector<8x128xf32>
    %cst_10 = arith.constant 0.000000e+00 : f32
    %9 = vector.broadcast %cst_10 : f32 to vector<8x128xf32>
    %c0_11 = arith.constant 0 : index
    %c0_12 = arith.constant 0 : index
    %10 = vector.load %arg7[%c0_11, %c0_12] : memref<64x512xf32, #tpu.memory_space<vmem>>, vector<8x512xf32>
    %11 = arith.truncf %8 : vector<8x128xf32> to vector<8x128xbf16>
    %c0_13 = arith.constant 0 : index
    %c0_14 = arith.constant 0 : index
    %12 = vector.load %arg2[%c0_13, %c0_14] : memref<128x512xbf16, #tpu.memory_space<vmem>>, vector<128x512xbf16>
    %cst_15 = arith.constant dense<0.000000e+00> : vector<8x512xf32>
    %13 = tpu.matmul %11, %12, %cst_15 {dimension_numbers = #tpu.dot_dimension_numbers<[1], [0], [0], [1], [0, 0, 1, 1], [], []>} : vector<8x128xbf16>, vector<128x512xbf16>, vector<8x512xf32> -> vector<8x512xf32>
    %14 = arith.addf %10, %13 : vector<8x512xf32>
    %15 = vector.extract_strided_slice %14 {offsets = [0, 0], sizes = [8, 384], strides = [1, 1]} : vector<8x512xf32> to vector<8x384xf32>
    %16 = arith.negf %15 : vector<8x384xf32>
    %17 = math.exp %16 : vector<8x384xf32>
    %cst_16 = arith.constant 1.000000e+00 : f32
    %18 = vector.broadcast %cst_16 : f32 to vector<8x384xf32>
    %19 = arith.addf %18, %17 : vector<8x384xf32>
    %20 = arith.divf %18, %19 : vector<8x384xf32>
    %21 = vector.extract_strided_slice %20 {offsets = [0, 0], sizes = [8, 128], strides = [1, 1]} : vector<8x384xf32> to vector<8x128xf32>
    %22 = vector.extract_strided_slice %20 {offsets = [0, 128], sizes = [8, 128], strides = [1, 1]} : vector<8x384xf32> to vector<8x128xf32>
    %23 = vector.extract_strided_slice %20 {offsets = [0, 256], sizes = [8, 128], strides = [1, 1]} : vector<8x384xf32> to vector<8x128xf32>
    %24 = vector.extract_strided_slice %14 {offsets = [0, 384], sizes = [8, 128], strides = [1, 1]} : vector<8x512xf32> to vector<8x128xf32>
    %25 = math.tanh %24 : vector<8x128xf32>
    %26 = arith.mulf %22, %9 : vector<8x128xf32>
    %27 = arith.mulf %21, %25 : vector<8x128xf32>
    %28 = arith.addf %26, %27 : vector<8x128xf32>
    %29 = math.tanh %28 : vector<8x128xf32>
    %30 = arith.mulf %23, %29 : vector<8x128xf32>
    %31 = vector.broadcast %7 : vector<1x128xf32> to vector<8x128xf32>
    %32 = arith.mulf %30, %31 : vector<8x128xf32>
    %cst_17 = arith.constant dense<0.000000e+00> : vector<8xf32>
    %33 = vector.multi_reduction <add>, %32, %cst_17 [1] : vector<8x128xf32> to vector<8xf32>
    %34 = vector.shape_cast %33 : vector<8xf32> to vector<8x1xf32>
    %c8 = arith.constant 8 : index
    %c0_18 = arith.constant 0 : index
    %35 = vector.load %arg7[%c8, %c0_18] : memref<64x512xf32, #tpu.memory_space<vmem>>, vector<8x512xf32>
    %36 = arith.truncf %30 : vector<8x128xf32> to vector<8x128xbf16>
    %c0_19 = arith.constant 0 : index
    %c0_20 = arith.constant 0 : index
    %37 = vector.load %arg2[%c0_19, %c0_20] : memref<128x512xbf16, #tpu.memory_space<vmem>>, vector<128x512xbf16>
    %cst_21 = arith.constant dense<0.000000e+00> : vector<8x512xf32>
    %38 = tpu.matmul %36, %37, %cst_21 {dimension_numbers = #tpu.dot_dimension_numbers<[1], [0], [0], [1], [0, 0, 1, 1], [], []>} : vector<8x128xbf16>, vector<128x512xbf16>, vector<8x512xf32> -> vector<8x512xf32>
    %39 = arith.addf %35, %38 : vector<8x512xf32>
    %40 = vector.extract_strided_slice %39 {offsets = [0, 0], sizes = [8, 384], strides = [1, 1]} : vector<8x512xf32> to vector<8x384xf32>
    %41 = arith.negf %40 : vector<8x384xf32>
    %42 = math.exp %41 : vector<8x384xf32>
    %cst_22 = arith.constant 1.000000e+00 : f32
    %43 = vector.broadcast %cst_22 : f32 to vector<8x384xf32>
    %44 = arith.addf %43, %42 : vector<8x384xf32>
    %45 = arith.divf %43, %44 : vector<8x384xf32>
    %46 = vector.extract_strided_slice %45 {offsets = [0, 0], sizes = [8, 128], strides = [1, 1]} : vector<8x384xf32> to vector<8x128xf32>
    %47 = vector.extract_strided_slice %45 {offsets = [0, 128], sizes = [8, 128], strides = [1, 1]} : vector<8x384xf32> to vector<8x128xf32>
    %48 = vector.extract_strided_slice %45 {offsets = [0, 256], sizes = [8, 128], strides = [1, 1]} : vector<8x384xf32> to vector<8x128xf32>
    %49 = vector.extract_strided_slice %39 {offsets = [0, 384], sizes = [8, 128], strides = [1, 1]} : vector<8x512xf32> to vector<8x128xf32>
    %50 = math.tanh %49 : vector<8x128xf32>
    %51 = arith.mulf %47, %28 : vector<8x128xf32>
    %52 = arith.mulf %46, %50 : vector<8x128xf32>
    %53 = arith.addf %51, %52 : vector<8x128xf32>
    %54 = math.tanh %53 : vector<8x128xf32>
    %55 = arith.mulf %48, %54 : vector<8x128xf32>
    %56 = vector.broadcast %7 : vector<1x128xf32> to vector<8x128xf32>
    %57 = arith.mulf %55, %56 : vector<8x128xf32>
    %cst_23 = arith.constant dense<0.000000e+00> : vector<8xf32>
    %58 = vector.multi_reduction <add>, %57, %cst_23 [1] : vector<8x128xf32> to vector<8xf32>
    %59 = vector.shape_cast %58 : vector<8xf32> to vector<8x1xf32>
    %c16 = arith.constant 16 : index
    %c0_24 = arith.constant 0 : index
    %60 = vector.load %arg7[%c16, %c0_24] : memref<64x512xf32, #tpu.memory_space<vmem>>, vector<8x512xf32>
    %61 = arith.truncf %55 : vector<8x128xf32> to vector<8x128xbf16>
    %c0_25 = arith.constant 0 : index
    %c0_26 = arith.constant 0 : index
    %62 = vector.load %arg2[%c0_25, %c0_26] : memref<128x512xbf16, #tpu.memory_space<vmem>>, vector<128x512xbf16>
    %cst_27 = arith.constant dense<0.000000e+00> : vector<8x512xf32>
    %63 = tpu.matmul %61, %62, %cst_27 {dimension_numbers = #tpu.dot_dimension_numbers<[1], [0], [0], [1], [0, 0, 1, 1], [], []>} : vector<8x128xbf16>, vector<128x512xbf16>, vector<8x512xf32> -> vector<8x512xf32>
    %64 = arith.addf %60, %63 : vector<8x512xf32>
    %65 = vector.extract_strided_slice %64 {offsets = [0, 0], sizes = [8, 384], strides = [1, 1]} : vector<8x512xf32> to vector<8x384xf32>
    %66 = arith.negf %65 : vector<8x384xf32>
    %67 = math.exp %66 : vector<8x384xf32>
    %cst_28 = arith.constant 1.000000e+00 : f32
    %68 = vector.broadcast %cst_28 : f32 to vector<8x384xf32>
    %69 = arith.addf %68, %67 : vector<8x384xf32>
    %70 = arith.divf %68, %69 : vector<8x384xf32>
    %71 = vector.extract_strided_slice %70 {offsets = [0, 0], sizes = [8, 128], strides = [1, 1]} : vector<8x384xf32> to vector<8x128xf32>
    %72 = vector.extract_strided_slice %70 {offsets = [0, 128], sizes = [8, 128], strides = [1, 1]} : vector<8x384xf32> to vector<8x128xf32>
    %73 = vector.extract_strided_slice %70 {offsets = [0, 256], sizes = [8, 128], strides = [1, 1]} : vector<8x384xf32> to vector<8x128xf32>
    %74 = vector.extract_strided_slice %64 {offsets = [0, 384], sizes = [8, 128], strides = [1, 1]} : vector<8x512xf32> to vector<8x128xf32>
    %75 = math.tanh %74 : vector<8x128xf32>
    %76 = arith.mulf %72, %53 : vector<8x128xf32>
    %77 = arith.mulf %71, %75 : vector<8x128xf32>
    %78 = arith.addf %76, %77 : vector<8x128xf32>
    %79 = math.tanh %78 : vector<8x128xf32>
    %80 = arith.mulf %73, %79 : vector<8x128xf32>
    %81 = vector.broadcast %7 : vector<1x128xf32> to vector<8x128xf32>
    %82 = arith.mulf %80, %81 : vector<8x128xf32>
    %cst_29 = arith.constant dense<0.000000e+00> : vector<8xf32>
    %83 = vector.multi_reduction <add>, %82, %cst_29 [1] : vector<8x128xf32> to vector<8xf32>
    %84 = vector.shape_cast %83 : vector<8xf32> to vector<8x1xf32>
    %c24 = arith.constant 24 : index
    %c0_30 = arith.constant 0 : index
    %85 = vector.load %arg7[%c24, %c0_30] : memref<64x512xf32, #tpu.memory_space<vmem>>, vector<8x512xf32>
    %86 = arith.truncf %80 : vector<8x128xf32> to vector<8x128xbf16>
    %c0_31 = arith.constant 0 : index
    %c0_32 = arith.constant 0 : index
    %87 = vector.load %arg2[%c0_31, %c0_32] : memref<128x512xbf16, #tpu.memory_space<vmem>>, vector<128x512xbf16>
    %cst_33 = arith.constant dense<0.000000e+00> : vector<8x512xf32>
    %88 = tpu.matmul %86, %87, %cst_33 {dimension_numbers = #tpu.dot_dimension_numbers<[1], [0], [0], [1], [0, 0, 1, 1], [], []>} : vector<8x128xbf16>, vector<128x512xbf16>, vector<8x512xf32> -> vector<8x512xf32>
    %89 = arith.addf %85, %88 : vector<8x512xf32>
    %90 = vector.extract_strided_slice %89 {offsets = [0, 0], sizes = [8, 384], strides = [1, 1]} : vector<8x512xf32> to vector<8x384xf32>
    %91 = arith.negf %90 : vector<8x384xf32>
    %92 = math.exp %91 : vector<8x384xf32>
    %cst_34 = arith.constant 1.000000e+00 : f32
    %93 = vector.broadcast %cst_34 : f32 to vector<8x384xf32>
    %94 = arith.addf %93, %92 : vector<8x384xf32>
    %95 = arith.divf %93, %94 : vector<8x384xf32>
    %96 = vector.extract_strided_slice %95 {offsets = [0, 0], sizes = [8, 128], strides = [1, 1]} : vector<8x384xf32> to vector<8x128xf32>
    %97 = vector.extract_strided_slice %95 {offsets = [0, 128], sizes = [8, 128], strides = [1, 1]} : vector<8x384xf32> to vector<8x128xf32>
    %98 = vector.extract_strided_slice %95 {offsets = [0, 256], sizes = [8, 128], strides = [1, 1]} : vector<8x384xf32> to vector<8x128xf32>
    %99 = vector.extract_strided_slice %89 {offsets = [0, 384], sizes = [8, 128], strides = [1, 1]} : vector<8x512xf32> to vector<8x128xf32>
    %100 = math.tanh %99 : vector<8x128xf32>
    %101 = arith.mulf %97, %78 : vector<8x128xf32>
    %102 = arith.mulf %96, %100 : vector<8x128xf32>
    %103 = arith.addf %101, %102 : vector<8x128xf32>
    %104 = math.tanh %103 : vector<8x128xf32>
    %105 = arith.mulf %98, %104 : vector<8x128xf32>
    %106 = vector.broadcast %7 : vector<1x128xf32> to vector<8x128xf32>
    %107 = arith.mulf %105, %106 : vector<8x128xf32>
    %cst_35 = arith.constant dense<0.000000e+00> : vector<8xf32>
    %108 = vector.multi_reduction <add>, %107, %cst_35 [1] : vector<8x128xf32> to vector<8xf32>
    %109 = vector.shape_cast %108 : vector<8xf32> to vector<8x1xf32>
    %c32 = arith.constant 32 : index
    %c0_36 = arith.constant 0 : index
    %110 = vector.load %arg7[%c32, %c0_36] : memref<64x512xf32, #tpu.memory_space<vmem>>, vector<8x512xf32>
    %111 = arith.truncf %105 : vector<8x128xf32> to vector<8x128xbf16>
    %c0_37 = arith.constant 0 : index
    %c0_38 = arith.constant 0 : index
    %112 = vector.load %arg2[%c0_37, %c0_38] : memref<128x512xbf16, #tpu.memory_space<vmem>>, vector<128x512xbf16>
    %cst_39 = arith.constant dense<0.000000e+00> : vector<8x512xf32>
    %113 = tpu.matmul %111, %112, %cst_39 {dimension_numbers = #tpu.dot_dimension_numbers<[1], [0], [0], [1], [0, 0, 1, 1], [], []>} : vector<8x128xbf16>, vector<128x512xbf16>, vector<8x512xf32> -> vector<8x512xf32>
    %114 = arith.addf %110, %113 : vector<8x512xf32>
    %115 = vector.extract_strided_slice %114 {offsets = [0, 0], sizes = [8, 384], strides = [1, 1]} : vector<8x512xf32> to vector<8x384xf32>
    %116 = arith.negf %115 : vector<8x384xf32>
    %117 = math.exp %116 : vector<8x384xf32>
    %cst_40 = arith.constant 1.000000e+00 : f32
    %118 = vector.broadcast %cst_40 : f32 to vector<8x384xf32>
    %119 = arith.addf %118, %117 : vector<8x384xf32>
    %120 = arith.divf %118, %119 : vector<8x384xf32>
    %121 = vector.extract_strided_slice %120 {offsets = [0, 0], sizes = [8, 128], strides = [1, 1]} : vector<8x384xf32> to vector<8x128xf32>
    %122 = vector.extract_strided_slice %120 {offsets = [0, 128], sizes = [8, 128], strides = [1, 1]} : vector<8x384xf32> to vector<8x128xf32>
    %123 = vector.extract_strided_slice %120 {offsets = [0, 256], sizes = [8, 128], strides = [1, 1]} : vector<8x384xf32> to vector<8x128xf32>
    %124 = vector.extract_strided_slice %114 {offsets = [0, 384], sizes = [8, 128], strides = [1, 1]} : vector<8x512xf32> to vector<8x128xf32>
    %125 = math.tanh %124 : vector<8x128xf32>
    %126 = arith.mulf %122, %103 : vector<8x128xf32>
    %127 = arith.mulf %121, %125 : vector<8x128xf32>
    %128 = arith.addf %126, %127 : vector<8x128xf32>
    %129 = math.tanh %128 : vector<8x128xf32>
    %130 = arith.mulf %123, %129 : vector<8x128xf32>
    %131 = vector.broadcast %7 : vector<1x128xf32> to vector<8x128xf32>
    %132 = arith.mulf %130, %131 : vector<8x128xf32>
    %cst_41 = arith.constant dense<0.000000e+00> : vector<8xf32>
    %133 = vector.multi_reduction <add>, %132, %cst_41 [1] : vector<8x128xf32> to vector<8xf32>
    %134 = vector.shape_cast %133 : vector<8xf32> to vector<8x1xf32>
    %c40 = arith.constant 40 : index
    %c0_42 = arith.constant 0 : index
    %135 = vector.load %arg7[%c40, %c0_42] : memref<64x512xf32, #tpu.memory_space<vmem>>, vector<8x512xf32>
    %136 = arith.truncf %130 : vector<8x128xf32> to vector<8x128xbf16>
    %c0_43 = arith.constant 0 : index
    %c0_44 = arith.constant 0 : index
    %137 = vector.load %arg2[%c0_43, %c0_44] : memref<128x512xbf16, #tpu.memory_space<vmem>>, vector<128x512xbf16>
    %cst_45 = arith.constant dense<0.000000e+00> : vector<8x512xf32>
    %138 = tpu.matmul %136, %137, %cst_45 {dimension_numbers = #tpu.dot_dimension_numbers<[1], [0], [0], [1], [0, 0, 1, 1], [], []>} : vector<8x128xbf16>, vector<128x512xbf16>, vector<8x512xf32> -> vector<8x512xf32>
    %139 = arith.addf %135, %138 : vector<8x512xf32>
    %140 = vector.extract_strided_slice %139 {offsets = [0, 0], sizes = [8, 384], strides = [1, 1]} : vector<8x512xf32> to vector<8x384xf32>
    %141 = arith.negf %140 : vector<8x384xf32>
    %142 = math.exp %141 : vector<8x384xf32>
    %cst_46 = arith.constant 1.000000e+00 : f32
    %143 = vector.broadcast %cst_46 : f32 to vector<8x384xf32>
    %144 = arith.addf %143, %142 : vector<8x384xf32>
    %145 = arith.divf %143, %144 : vector<8x384xf32>
    %146 = vector.extract_strided_slice %145 {offsets = [0, 0], sizes = [8, 128], strides = [1, 1]} : vector<8x384xf32> to vector<8x128xf32>
    %147 = vector.extract_strided_slice %145 {offsets = [0, 128], sizes = [8, 128], strides = [1, 1]} : vector<8x384xf32> to vector<8x128xf32>
    %148 = vector.extract_strided_slice %145 {offsets = [0, 256], sizes = [8, 128], strides = [1, 1]} : vector<8x384xf32> to vector<8x128xf32>
    %149 = vector.extract_strided_slice %139 {offsets = [0, 384], sizes = [8, 128], strides = [1, 1]} : vector<8x512xf32> to vector<8x128xf32>
    %150 = math.tanh %149 : vector<8x128xf32>
    %151 = arith.mulf %147, %128 : vector<8x128xf32>
    %152 = arith.mulf %146, %150 : vector<8x128xf32>
    %153 = arith.addf %151, %152 : vector<8x128xf32>
    %154 = math.tanh %153 : vector<8x128xf32>
    %155 = arith.mulf %148, %154 : vector<8x128xf32>
    %156 = vector.broadcast %7 : vector<1x128xf32> to vector<8x128xf32>
    %157 = arith.mulf %155, %156 : vector<8x128xf32>
    %cst_47 = arith.constant dense<0.000000e+00> : vector<8xf32>
    %158 = vector.multi_reduction <add>, %157, %cst_47 [1] : vector<8x128xf32> to vector<8xf32>
    %159 = vector.shape_cast %158 : vector<8xf32> to vector<8x1xf32>
    %c48 = arith.constant 48 : index
    %c0_48 = arith.constant 0 : index
    %160 = vector.load %arg7[%c48, %c0_48] : memref<64x512xf32, #tpu.memory_space<vmem>>, vector<8x512xf32>
    %161 = arith.truncf %155 : vector<8x128xf32> to vector<8x128xbf16>
    %c0_49 = arith.constant 0 : index
    %c0_50 = arith.constant 0 : index
    %162 = vector.load %arg2[%c0_49, %c0_50] : memref<128x512xbf16, #tpu.memory_space<vmem>>, vector<128x512xbf16>
    %cst_51 = arith.constant dense<0.000000e+00> : vector<8x512xf32>
    %163 = tpu.matmul %161, %162, %cst_51 {dimension_numbers = #tpu.dot_dimension_numbers<[1], [0], [0], [1], [0, 0, 1, 1], [], []>} : vector<8x128xbf16>, vector<128x512xbf16>, vector<8x512xf32> -> vector<8x512xf32>
    %164 = arith.addf %160, %163 : vector<8x512xf32>
    %165 = vector.extract_strided_slice %164 {offsets = [0, 0], sizes = [8, 384], strides = [1, 1]} : vector<8x512xf32> to vector<8x384xf32>
    %166 = arith.negf %165 : vector<8x384xf32>
    %167 = math.exp %166 : vector<8x384xf32>
    %cst_52 = arith.constant 1.000000e+00 : f32
    %168 = vector.broadcast %cst_52 : f32 to vector<8x384xf32>
    %169 = arith.addf %168, %167 : vector<8x384xf32>
    %170 = arith.divf %168, %169 : vector<8x384xf32>
    %171 = vector.extract_strided_slice %170 {offsets = [0, 0], sizes = [8, 128], strides = [1, 1]} : vector<8x384xf32> to vector<8x128xf32>
    %172 = vector.extract_strided_slice %170 {offsets = [0, 128], sizes = [8, 128], strides = [1, 1]} : vector<8x384xf32> to vector<8x128xf32>
    %173 = vector.extract_strided_slice %170 {offsets = [0, 256], sizes = [8, 128], strides = [1, 1]} : vector<8x384xf32> to vector<8x128xf32>
    %174 = vector.extract_strided_slice %164 {offsets = [0, 384], sizes = [8, 128], strides = [1, 1]} : vector<8x512xf32> to vector<8x128xf32>
    %175 = math.tanh %174 : vector<8x128xf32>
    %176 = arith.mulf %172, %153 : vector<8x128xf32>
    %177 = arith.mulf %171, %175 : vector<8x128xf32>
    %178 = arith.addf %176, %177 : vector<8x128xf32>
    %179 = math.tanh %178 : vector<8x128xf32>
    %180 = arith.mulf %173, %179 : vector<8x128xf32>
    %181 = vector.broadcast %7 : vector<1x128xf32> to vector<8x128xf32>
    %182 = arith.mulf %180, %181 : vector<8x128xf32>
    %cst_53 = arith.constant dense<0.000000e+00> : vector<8xf32>
    %183 = vector.multi_reduction <add>, %182, %cst_53 [1] : vector<8x128xf32> to vector<8xf32>
    %184 = vector.shape_cast %183 : vector<8xf32> to vector<8x1xf32>
    %c56 = arith.constant 56 : index
    %c0_54 = arith.constant 0 : index
    %185 = vector.load %arg7[%c56, %c0_54] : memref<64x512xf32, #tpu.memory_space<vmem>>, vector<8x512xf32>
    %186 = arith.truncf %180 : vector<8x128xf32> to vector<8x128xbf16>
    %c0_55 = arith.constant 0 : index
    %c0_56 = arith.constant 0 : index
    %187 = vector.load %arg2[%c0_55, %c0_56] : memref<128x512xbf16, #tpu.memory_space<vmem>>, vector<128x512xbf16>
    %cst_57 = arith.constant dense<0.000000e+00> : vector<8x512xf32>
    %188 = tpu.matmul %186, %187, %cst_57 {dimension_numbers = #tpu.dot_dimension_numbers<[1], [0], [0], [1], [0, 0, 1, 1], [], []>} : vector<8x128xbf16>, vector<128x512xbf16>, vector<8x512xf32> -> vector<8x512xf32>
    %189 = arith.addf %185, %188 : vector<8x512xf32>
    %190 = vector.extract_strided_slice %189 {offsets = [0, 0], sizes = [8, 384], strides = [1, 1]} : vector<8x512xf32> to vector<8x384xf32>
    %191 = arith.negf %190 : vector<8x384xf32>
    %192 = math.exp %191 : vector<8x384xf32>
    %cst_58 = arith.constant 1.000000e+00 : f32
    %193 = vector.broadcast %cst_58 : f32 to vector<8x384xf32>
    %194 = arith.addf %193, %192 : vector<8x384xf32>
    %195 = arith.divf %193, %194 : vector<8x384xf32>
    %196 = vector.extract_strided_slice %195 {offsets = [0, 0], sizes = [8, 128], strides = [1, 1]} : vector<8x384xf32> to vector<8x128xf32>
    %197 = vector.extract_strided_slice %195 {offsets = [0, 128], sizes = [8, 128], strides = [1, 1]} : vector<8x384xf32> to vector<8x128xf32>
    %198 = vector.extract_strided_slice %195 {offsets = [0, 256], sizes = [8, 128], strides = [1, 1]} : vector<8x384xf32> to vector<8x128xf32>
    %199 = vector.extract_strided_slice %189 {offsets = [0, 384], sizes = [8, 128], strides = [1, 1]} : vector<8x512xf32> to vector<8x128xf32>
    %200 = math.tanh %199 : vector<8x128xf32>
    %201 = arith.mulf %197, %178 : vector<8x128xf32>
    %202 = arith.mulf %196, %200 : vector<8x128xf32>
    %203 = arith.addf %201, %202 : vector<8x128xf32>
    %204 = math.tanh %203 : vector<8x128xf32>
    %205 = arith.mulf %198, %204 : vector<8x128xf32>
    %206 = vector.broadcast %7 : vector<1x128xf32> to vector<8x128xf32>
    %207 = arith.mulf %205, %206 : vector<8x128xf32>
    %cst_59 = arith.constant dense<0.000000e+00> : vector<8xf32>
    %208 = vector.multi_reduction <add>, %207, %cst_59 [1] : vector<8x128xf32> to vector<8xf32>
    %209 = vector.shape_cast %208 : vector<8xf32> to vector<8x1xf32>
    %210 = tpu.concatenate %34, %59, %84, %109, %134, %159, %184, %209 in 1 : vector<8x1xf32>, vector<8x1xf32>, vector<8x1xf32>, vector<8x1xf32>, vector<8x1xf32>, vector<8x1xf32>, vector<8x1xf32>, vector<8x1xf32> -> vector<8x8xf32>
    %c0_60 = arith.constant 0 : index
    %c0_61 = arith.constant 0 : index
    %211 = vector.load %arg5[%c0_60, %c0_61] : memref<1x1xf32, #tpu.memory_space<vmem>>, vector<1x1xf32>
    %212 = vector.broadcast %211 : vector<1x1xf32> to vector<8x8xf32>
    %213 = arith.addf %210, %212 : vector<8x8xf32>
    %214 = arith.negf %213 : vector<8x8xf32>
    %215 = math.exp %214 : vector<8x8xf32>
    %cst_62 = arith.constant 1.000000e+00 : f32
    %216 = vector.broadcast %cst_62 : f32 to vector<8x8xf32>
    %217 = arith.addf %216, %215 : vector<8x8xf32>
    %218 = arith.divf %216, %217 : vector<8x8xf32>
    %cst_63 = arith.constant 0.000000e+00 : f32
    %219 = vector.broadcast %cst_63 : f32 to vector<8x120xf32>
    %220 = tpu.concatenate %218, %219 in 1 : vector<8x8xf32>, vector<8x120xf32> -> vector<8x128xf32>
    %c0_64 = arith.constant 0 : index
    %c0_65 = arith.constant 0 : index
    %221 = vector.load %arg6[%c0_64, %c0_65] : memref<8x128xf32, #tpu.memory_space<vmem>>, vector<8x128xf32>
    tpu.vector_store %arg6[%c0_64, %c0_65], %220 {strides = array<i32>} : memref<8x128xf32, #tpu.memory_space<vmem>>, vector<8x128xf32>,
    return
  }
}

</mosaic_0001>

<bundles_post_ra>
// kernel: lstm_classifier_forward.1
= control target key start
LH: loop header
LB: loop body
LE: loop exit
PB: predicated region body
PF: predicated region fallthrough
CT: control target
= control target key end

     0   :  { %v2595_v1 = vmov 0   ;;  %vm100_vm0 = vcmask 130048   ;;  %v40_v41 = vlaneseq  ;;  %vm1433_vm1 = vcmask 7168   ;;  %s2588_s1 = inlined_call_operand.vmem [shape: bf16[16,512], index: 1, kind: input, shape index: {}]   ;;  %s2589_s0 = inlined_call_operand.vmem [shape: bf16[64,16], index: 0, kind: input, shape index: {}]   ;;  %s2590_s2 = inlined_call_operand.vmem [shape: bf16[128,512], index: 2, kind: input, shape index: {}]   ;;  %s2591_s3 = inlined_call_operand.vmem [shape: f32[1,512], index: 3, kind: input, shape index: {}]   ;;  %s2592_s4 = inlined_call_operand.vmem [shape: f32[1,128], index: 4, kind: input, shape index: {}]   ;;  %s2593_s5 = inlined_call_operand.<no memory space> [shape: f32[1,1], index: 5, kind: input, shape index: {}]   ;;  %s2594_s6 = inlined_call_operand.vmem [shape: f32[8,128], index: 6, kind: output, shape index: {}]  }
   0x1   :  { %v1548_v0 = vld [vmem:[%s2588_s1 + $0x4] ss:$16 sps:$4 sm:$0xff]   ;;  %145 = vmatprep.mubr.bf16.mxu0 %v2595_v1  ;;  %218 = vmatprep.mubr.bf16.mxu1 %v2595_v1  ;;  %v1550_v2 = vld [vmem:[%s2588_s1 + $0xc] ss:$16 sps:$4 sm:$0xff]   ;;  %v1552_v3 = vld [vmem:[%s2588_s1] ss:$16 sps:$4 sm:$0xff]  }
   0x2   :  { %1547 = vset.pattern.permute.xlu0 %v2595_v1  ;;  %127 = vmatprep.subr.bf16.mxu0 %v1548_v0  ;;  %v1553_v4 = vld [vmem:[%s2588_s1 + $0x8] ss:$16 sps:$4 sm:$0xff]   ;;  %v1554_v5 = vld [vmem:[%s2589_s0] sm:$0xff]   ;;  %v1832_v7 = vld [vmem:[%s2590_s2 + $0xec] ss:$16 sps:$4 sm:$0xff]   ;;  %v41_v42 = vshrl.u32 %v40_v41, 7 }
   0x3   :  { %200 = vmatprep.subr.bf16.mxu1 %v1550_v2  ;;  %128 = vmatpush1.bf16.msra.mxu0 %v1552_v3  ;;  %v1827_v6 = vld [vmem:[%s2590_s2 + $0xe4] ss:$16 sps:$4 sm:$0xff]   ;;  %v1837_v8 = vld [vmem:[%s2590_s2 + $0xe0] ss:$16 sps:$4 sm:$0xff]   ;;  %v1843_v9 = vld [vmem:[%s2590_s2 + $0xe8] ss:$16 sps:$4 sm:$0xff]  }
   0x4   :  { %201 = vmatpush1.bf16.msra.mxu1 %v1553_v4  ;;  %488 = vmatprep.subr.bf16.mxu0 %v1827_v6  ;;  %v1850_v10 = vld [vmem:[%s2590_s2 + $0xc4] ss:$16 sps:$4 sm:$0xff]   ;;  %v1857_v11 = vld [vmem:[%s2590_s2 + $0xcc] ss:$16 sps:$4 sm:$0xff]   ;;  %v1862_v12 = vld [vmem:[%s2590_s2 + $0xc0] ss:$16 sps:$4 sm:$0xff]  }
   0x5   :  { %529 = vmatprep.subr.bf16.mxu1 %v1832_v7  ;;  %v1867_v13 = vld [vmem:[%s2590_s2 + $0xc8] ss:$16 sps:$4 sm:$0xff]   ;;  %v1879_v15 = vld [vmem:[%s2590_s2 + $0xa4] ss:$16 sps:$4 sm:$0xff]   ;;  %v1885_v16 = vld [vmem:[%s2590_s2 + $0xac] ss:$16 sps:$4 sm:$0xff]  }
   0x6   :  { %1479 = vmatmul.mubr.msk.bf16.vlgmr.msra.gmra.mxu0 %vm100_vm0, %v1554_v5  ;;  %v1567_v14 = vld [vmem:[%s2589_s0 + $0x8] sm:$0xff]   ;;  %v1891_v17 = vld [vmem:[%s2590_s2 + $0xa0] ss:$16 sps:$4 sm:$0xff]   ;;  %v1903_v19 = vld [vmem:[%s2590_s2 + $0x84] ss:$16 sps:$4 sm:$0xff]   ;;  %v50_v43 = vsub.s32 2, %v41_v42 }
   0x7   :  { %1483 = vmatmul.mubr.msk.bf16.vlgmr.msra.gmra.mxu1 %vm100_vm0, %v1554_v5  ;;  %489 = vmatpush1.bf16.msra.mxu0 %v1837_v8  ;;  %v1896_v18 = vld [vmem:[%s2590_s2 + $0xa8] ss:$16 sps:$4 sm:$0xff]   ;;  %v1909_v20 = vld [vmem:[%s2590_s2 + $0x8c] ss:$16 sps:$4 sm:$0xff]   ;;  %v1916_v21 = vld [vmem:[%s2590_s2 + $0x80] ss:$16 sps:$4 sm:$0xff]  }
   0x8   :  { %530 = vmatpush1.bf16.msra.mxu1 %v1843_v9  ;;  %490 = vmatprep.subr.bf16.mxu0 %v1850_v10  ;;  %v1922_v22 = vld [vmem:[%s2590_s2 + $0x88] ss:$16 sps:$4 sm:$0xff]   ;;  %v1930_v23 = vld [vmem:[%s2590_s2 + $0x64] ss:$16 sps:$4 sm:$0xff]   ;;  %v1937_v24 = vld [vmem:[%s2590_s2 + $0x6c] ss:$16 sps:$4 sm:$0xff]  }
   0x9   :  { %531 = vmatprep.subr.bf16.mxu1 %v1857_v11  ;;  %155 = vmatprep.mubr.bf16.mxu0 %v2595_v1  ;;  %v1580_v25 = vld [vmem:[%s2589_s0 + $0x10] sm:$0xff]   ;;  %v1953_v27 = vld [vmem:[%s2590_s2 + $0x68] ss:$16 sps:$4 sm:$0xff]   ;;  %v1964_v29 = vld [vmem:[%s2590_s2 + $0x4c] ss:$16 sps:$4 sm:$0xff]   ;;  %v42_v44 = vsub.s32 0, %v41_v42 }
   0xa   :  { %228 = vmatprep.mubr.bf16.mxu1 %v2595_v1  ;;  %v1946_v26 = vld [vmem:[%s2590_s2 + $0x60] ss:$16 sps:$4 sm:$0xff]   ;;  %v1958_v28 = vld [vmem:[%s2590_s2 + $0x44] ss:$16 sps:$4 sm:$0xff]   ;;  %v1977_v31 = vld [vmem:[%s2590_s2 + $0x48] ss:$16 sps:$4 sm:$0xff]  }
   0xb   :  { %491 = vmatpush1.bf16.msra.mxu0 %v1862_v12  ;;  %v1972_v30 = vld [vmem:[%s2590_s2 + $0x40] ss:$16 sps:$4 sm:$0xff]   ;;  %v1985_v32 = vld [vmem:[%s2590_s2 + $0x24] ss:$16 sps:$4 sm:$0xff]   ;;  %v1992_v33 = vld [vmem:[%s2590_s2 + $0x2c] ss:$16 sps:$4 sm:$0xff]  }
   0xc   :  { %532 = vmatpush1.bf16.msra.mxu1 %v1867_v13  ;;  %492 = vmatprep.subr.bf16.mxu0 %v1879_v15  ;;  %v1593_v34 = vld [vmem:[%s2589_s0 + $0x18] sm:$0xff]   ;;  %v2001_v35 = vld [vmem:[%s2590_s2 + $0x20] ss:$16 sps:$4 sm:$0xff]   ;;  %v2013_v37 = vld [vmem:[%s2590_s2 + $0x4] ss:$16 sps:$4 sm:$0xff]   ;;  %v54_v45 = vsub.s32 3, %v41_v42 }
   0xd   :  { %533 = vmatprep.subr.bf16.mxu1 %v1885_v16  ;;  %v2008_v36 = vld [vmem:[%s2590_s2 + $0x28] ss:$16 sps:$4 sm:$0xff]   ;;  %v2019_v38 = vld [vmem:[%s2590_s2 + $0xc] ss:$16 sps:$4 sm:$0xff]   ;;  %v2027_v39 = vld [vmem:[%s2590_s2] ss:$16 sps:$4 sm:$0xff]  }
   0xe   :  { %1480 = vmatmul.mubr.msk.bf16.gmra.mxu0 %vm100_vm0, %v1567_v14  ;;  %v2035_v40 = vld [vmem:[%s2590_s2 + $0x8] ss:$16 sps:$4 sm:$0xff]   ;;  %v38_v46 = vld [vmem:[%s2591_s3] sm:$0xf]  ;;  %v46_v50 = vsub.s32 1, %v41_v42  ;;  %vm1435_vm2 = vcmask 15360  }
   0xf   :  { %1484 = vmatmul.mubr.msk.bf16.gmra.mxu1 %vm100_vm0, %v1567_v14  ;;  %493 = vmatpush1.bf16.msra.mxu0 %v1891_v17  ;;  %v2086_v49 = vrot.slane %v38_v46, %v50_v43  ;;  %v43_v53 = vrot.slane %v38_v46, %v42_v44  ;;  %v2092_v54 = vrot.slane %v38_v46, %v54_v45  ;;  %vm1437_vm3 = vcmask 23552  }
  0x10   :  { %165 = vmatprep.mubr.bf16.mxu0 %v2595_v1  ;;  %534 = vmatpush1.bf16.msra.mxu1 %v1896_v18  ;;  %v47_v57 = vrot.slane %v38_v46, %v46_v50  ;;  %vm1439_vm4 = vcmask 31744   ;;  %vm1441_vm5 = vcmask 39936   ;;  %vm1443_vm6 = vcmask 48128  }
  0x11   :  { %494 = vmatprep.subr.bf16.mxu0 %v1903_v19  ;;  %535 = vmatprep.subr.bf16.mxu1 %v1909_v20  ;;  %vm1445_vm7 = vcmask 56320   ;;  %vm1464_vm8 = vcmask 64512  }
  0x12   :  { %238 = vmatprep.mubr.bf16.mxu1 %v2595_v1 }
  0x13   :  { %495 = vmatpush1.bf16.msra.mxu0 %v1916_v21 }
  0x14   :  { %536 = vmatpush1.bf16.msra.mxu1 %v1922_v22  ;;  %496 = vmatprep.subr.bf16.mxu0 %v1930_v23 }
  0x15   :  { %537 = vmatprep.subr.bf16.mxu1 %v1937_v24 }
  0x16   :  { %1481 = vmatmul.mubr.msk.bf16.gmra.mxu0 %vm100_vm0, %v1580_v25 }
  0x17   :  { %1485 = vmatmul.mubr.msk.bf16.gmra.mxu1 %vm100_vm0, %v1580_v25  ;;  %497 = vmatpush1.bf16.msra.mxu0 %v1946_v26 }
  0x18   :  { %175 = vmatprep.mubr.bf16.mxu0 %v2595_v1  ;;  %538 = vmatpush1.bf16.msra.mxu1 %v1953_v27 }
  0x19   :  { %498 = vmatprep.subr.bf16.mxu0 %v1958_v28  ;;  %539 = vmatprep.subr.bf16.mxu1 %v1964_v29 }
  0x1a   :  { %248 = vmatprep.mubr.bf16.mxu1 %v2595_v1 }
  0x1b   :  { %499 = vmatpush1.bf16.msra.mxu0 %v1972_v30 }
  0x1c   :  { %540 = vmatpush1.bf16.msra.mxu1 %v1977_v31  ;;  %500 = vmatprep.subr.bf16.mxu0 %v1985_v32 }
  0x1d   :  { %541 = vmatprep.subr.bf16.mxu1 %v1992_v33 }
  0x1e   :  { %1482 = vmatmul.mubr.msk.bf16.gmra.mxu0 %vm100_vm0, %v1593_v34 }
  0x1f   :  { %1486 = vmatmul.mubr.msk.bf16.gmra.mxu1 %vm100_vm0, %v1593_v34  ;;  %501 = vmatpush1.bf16.msra.mxu0 %v2001_v35 }
  0x20   :  { %520 = vmatprep.mubr.bf16.mxu0 %v2595_v1  ;;  %542 = vmatpush1.bf16.msra.mxu1 %v2008_v36 }
  0x21   :  { %502 = vmatprep.subr.bf16.mxu0 %v2013_v37  ;;  %543 = vmatprep.subr.bf16.mxu1 %v2019_v38 }
  0x22   :  { %561 = vmatprep.mubr.bf16.mxu1 %v2595_v1 }
  0x23   :  { %503 = vmatpush1.bf16.msra.mxu0 %v2027_v39 }
  0x24   :  { %544 = vmatpush1.bf16.msra.mxu1 %v2035_v40  ;;  %612 = vmatprep.subr.bf16.mxu0 %v1827_v6 }
  0x25   :  { %653 = vmatprep.subr.bf16.mxu1 %v1832_v7 }
  0x26   :  { %521 = vmatmul.mubr.bf16.vlgmr.msra.gmra.mxu0 %v2595_v1 }
  0x27   :  { %562 = vmatmul.mubr.bf16.vlgmr.msra.gmra.mxu1 %v2595_v1  ;;  %613 = vmatpush1.bf16.msra.mxu0 %v1837_v8 }
  0x28   :  { %654 = vmatpush1.bf16.msra.mxu1 %v1843_v9  ;;  %614 = vmatprep.subr.bf16.mxu0 %v1850_v10 }
  0x29   :  { %655 = vmatprep.subr.bf16.mxu1 %v1857_v11  ;;  %644 = vmatprep.mubr.bf16.mxu0 %v2595_v1 }
  0x2a   :  { %685 = vmatprep.mubr.bf16.mxu1 %v2595_v1 }
  0x2b   :  { %615 = vmatpush1.bf16.msra.mxu0 %v1862_v12 }
  0x2c   :  { %656 = vmatpush1.bf16.msra.mxu1 %v1867_v13  ;;  %616 = vmatprep.subr.bf16.mxu0 %v1879_v15 }
  0x2d   :  { %657 = vmatprep.subr.bf16.mxu1 %v1885_v16 }
  0x2f   :  { %617 = vmatpush1.bf16.msra.mxu0 %v1891_v17 }
  0x30   :  { %658 = vmatpush1.bf16.msra.mxu1 %v1896_v18  ;;  %618 = vmatprep.subr.bf16.mxu0 %v1903_v19 }
  0x31   :  { %659 = vmatprep.subr.bf16.mxu1 %v1909_v20 }
  0x33   :  { %619 = vmatpush1.bf16.msra.mxu0 %v1916_v21 }
  0x34   :  { %660 = vmatpush1.bf16.msra.mxu1 %v1922_v22  ;;  %620 = vmatprep.subr.bf16.mxu0 %v1930_v23 }
  0x35   :  { %661 = vmatprep.subr.bf16.mxu1 %v1937_v24 }
  0x37   :  { %621 = vmatpush1.bf16.msra.mxu0 %v1946_v26 }
  0x38   :  { %662 = vmatpush1.bf16.msra.mxu1 %v1953_v27  ;;  %622 = vmatprep.subr.bf16.mxu0 %v1958_v28 }
  0x39   :  { %663 = vmatprep.subr.bf16.mxu1 %v1964_v29 }
  0x3b   :  { %623 = vmatpush1.bf16.msra.mxu0 %v1972_v30 }
  0x3c   :  { %664 = vmatpush1.bf16.msra.mxu1 %v1977_v31  ;;  %624 = vmatprep.subr.bf16.mxu0 %v1985_v32 }
  0x3d   :  { %665 = vmatprep.subr.bf16.mxu1 %v1992_v33 }
  0x3f   :  { %625 = vmatpush1.bf16.msra.mxu0 %v2001_v35 }
  0x40   :  { %666 = vmatpush1.bf16.msra.mxu1 %v2008_v36  ;;  %626 = vmatprep.subr.bf16.mxu0 %v2013_v37 }
  0x41   :  { %667 = vmatprep.subr.bf16.mxu1 %v2019_v38 }
  0x43   :  { %627 = vmatpush1.bf16.msra.mxu0 %v2027_v39 }
  0x44   :  { %668 = vmatpush1.bf16.msra.mxu1 %v2035_v40  ;;  %730 = vmatprep.subr.bf16.mxu0 %v1827_v6 }
  0x45   :  { %771 = vmatprep.subr.bf16.mxu1 %v1832_v7 }
  0xc6   :  { %v2082_v47 = vpop.f32.mrf.mxu0 }
  0xc7   :  { %v2084_v48 = vpop.f32.mrf.mxu1 }
  0xc8   :  { %v2088_v51 = vpop.f32.mrf.mxu0 }
  0xc9   :  { %v2090_v52 = vpop.f32.mrf.mxu1 }
  0xca   :  { %v151_v55 = vpop.f32.mrf.mxu0 }
  0xcb   :  { %v224_v56 = vpop.f32.mrf.mxu1  ;;  %v2094_v58 = vadd.f32 %v151_v55, %v43_v53 }
  0xcc   :  { %v2097_v59 = vadd.f32 %v224_v56, %v2086_v49  ;;  %v153_v60 = vpop.f32.mrf.mxu0 }
  0xcd   :  { %v226_v61 = vpop.f32.mrf.mxu1  ;;  %v2099_v62 = vadd.f32 %v153_v60, %v47_v57 }
  0xce   :  { %v2102_v63 = vadd.f32 %v226_v61, %v2092_v54  ;;  %v157_v0 = vpop.f32.mrf.mxu0 }
  0xcf   :  { %v230_v2 = vpop.f32.mrf.mxu1  ;;  %v2104_v3 = vadd.f32 %v157_v0, %v43_v53 }
  0xd0   :  { %v2107_v4 = vadd.f32 %v230_v2, %v2086_v49  ;;  %v159_v5 = vpop.f32.mrf.mxu0 }
  0xd1   :  { %v232_v14 = vpop.f32.mrf.mxu1  ;;  %v2109_v25 = vadd.f32 %v159_v5, %v47_v57 }
  0xd2   :  { %v2112_v34 = vadd.f32 %v232_v14, %v2092_v54  ;;  %v161_v41 = vpop.f32.mrf.mxu0 }
  0xd3   :  { %v234_v42 = vpop.f32.mrf.mxu1  ;;  %v2114_v43 = vadd.f32 %v161_v41, %v43_v53 }
  0xd4   :  { %2597 = vst [vmem:[#allocation4_spill] sm:$0xff] %v2112_v34  ;;  %v2117_v44 = vadd.f32 %v234_v42, %v2086_v49  ;;  %v163_v45 = vpop.f32.mrf.mxu0 }
  0xd5   :  { %2598 = vst [vmem:[#allocation5_spill] sm:$0xff] %v2114_v43  ;;  %v236_v46 = vpop.f32.mrf.mxu1  ;;  %v2119_v50 = vadd.f32 %v163_v45, %v47_v57 }
  0xd6   :  { %2599 = vst [vmem:[#allocation6_spill] sm:$0xff] %v2117_v44  ;;  %v2122_v55 = vadd.f32 %v236_v46, %v2092_v54  ;;  %v167_v56 = vpop.f32.mrf.mxu0 }
  0xd7   :  { %2600 = vst [vmem:[#allocation7_spill] sm:$0xff] %v2119_v50  ;;  %v240_v60 = vpop.f32.mrf.mxu1  ;;  %v2124_v61 = vadd.f32 %v167_v56, %v43_v53 }
  0xd8   :  { %2601 = vst [vmem:[#allocation8_spill] sm:$0xff] %v2122_v55  ;;  %v2127_v0 = vadd.f32 %v240_v60, %v2086_v49  ;;  %v169_v2 = vpop.f32.mrf.mxu0 }
  0xd9   :  { %2602 = vst [vmem:[#allocation9_spill] sm:$0xff] %v2124_v61  ;;  %v242_v5 = vpop.f32.mrf.mxu1  ;;  %v2129_v14 = vadd.f32 %v169_v2, %v47_v57 }
  0xda   :  { %2603 = vst [vmem:[#allocation10_spill] sm:$0xff] %v2127_v0  ;;  %v2132_v41 = vadd.f32 %v242_v5, %v2092_v54  ;;  %v171_v42 = vpop.f32.mrf.mxu0 }
  0xdb   :  { %2604 = vst [vmem:[#allocation11_spill] sm:$0xff] %v2129_v14  ;;  %v244_v45 = vpop.f32.mrf.mxu1  ;;  %v2134_v1 = vadd.f32 %v171_v42, %v43_v53 }
  0xdc   :  { %2605 = vst [vmem:[#allocation12_spill] sm:$0xff] %v2132_v41  ;;  %v2137_v46 = vadd.f32 %v244_v45, %v2086_v49  ;;  %v173_v55 = vpop.f32.mrf.mxu0 }
  0xdd   :  { %2606 = vst [vmem:[#allocation13_spill] sm:$0xff] %v2134_v1  ;;  %v246_v56 = vpop.f32.mrf.mxu1  ;;  %v2139_v61 = vadd.f32 %v173_v55, %v47_v57 }
  0xde   :  { %2607 = vst [vmem:[#allocation14_spill] sm:$0xff] %v2137_v46  ;;  %v2142_v60 = vadd.f32 %v246_v56, %v2092_v54  ;;  %v177_v0 = vpop.f32.mrf.mxu0 }
  0xdf   :  { %2608 = vst [vmem:[#allocation15_spill] sm:$0xff] %v2139_v61  ;;  %v250_v2 = vpop.f32.mrf.mxu1  ;;  %v2144_v14 = vadd.f32 %v177_v0, %v43_v53 }
  0xe0   :  { %2609 = vst [vmem:[#allocation16_spill] sm:$0xff] %v2142_v60  ;;  %v2147_v5 = vadd.f32 %v250_v2, %v2086_v49  ;;  %v179_v41 = vpop.f32.mrf.mxu0 }
  0xe1   :  { %2610 = vst [vmem:[#allocation17_spill] sm:$0xff] %v2144_v14  ;;  %v252_v42 = vpop.f32.mrf.mxu1  ;;  %v2149_v1 = vadd.f32 %v179_v41, %v47_v57  ;;  %v148_v14 = vadd.f32 %v2082_v47, %v43_v53 }
  0xe2   :  { %2611 = vst [vmem:[#allocation18_spill] sm:$0xff] %v2147_v5  ;;  %v2152_v45 = vadd.f32 %v252_v42, %v2092_v54  ;;  %v181_v46 = vpop.f32.mrf.mxu0  ;;  %v150_v42 = vadd.f32 %v2088_v51, %v47_v57  ;;  %v223_v51 = vadd.f32 %v2090_v52, %v2092_v54 }
  0xe3   :  { %2612 = vst [vmem:[#allocation19_spill] sm:$0xff] %v2149_v1  ;;  %v254_v55 = vpop.f32.mrf.mxu1  ;;  %v2154_v61 = vadd.f32 %v181_v46, %v43_v53  ;;  %v221_v53 = vadd.f32 %v2084_v48, %v2086_v49 }
  0xe4   :  { %2613 = vst [vmem:[#allocation20_spill] sm:$0xff] %v2152_v45  ;;  %v2157_v56 = vadd.f32 %v254_v55, %v2086_v49  ;;  %v183_v60 = vpop.f32.mrf.mxu0 }
  0xe5   :  { %2614 = vst [vmem:[#allocation21_spill] sm:$0xff] %v2154_v61  ;;  %v256_v0 = vpop.f32.mrf.mxu1  ;;  %v2160_v2 = vadd.f32 %v183_v60, %v47_v57 }
  0xe6   :  { %2615 = vst [vmem:[#allocation22_spill] sm:$0xff] %v2157_v56  ;;  %v2163_v5 = vadd.f32 %v256_v0, %v2092_v54  ;;  %v522_v41 = vpop.f32.mrf.mxu0 }
  0xe7   :  { %v570_v45 = vadd.f32 %v522_v41, %v148_v14  ;;  %v563_v1 = vpop.f32.mrf.mxu1 }
  0xe8   :  { %v524_v44 = vpop.f32.mrf.mxu0  ;;  %v572_v60 = vadd.f32 %v563_v1, %v221_v53  ;;  %v2616_v53 = vmov 0  }
  0xe9   :  { %v1519_v46 = vmul.f32 -1.442695, %v570_v45  ;;  %v571_v61 = vadd.f32 %v524_v44, %v150_v42  ;;  %v565_v50 = vpop.f32.mrf.mxu1 }
  0xea   :  { %v526_v55 = vpop.f32.mrf.mxu0  ;;  %v1521_v57 = vmul.f32 -1.442695, %v572_v60  ;;  %v573_v0 = vadd.f32 %v565_v50, %v223_v51  ;;  %v2176_v50 = vld [vmem:[%s2592_s4] ss:$0 sm:$0xff] }
  0xeb   :  { %1606 = vpow2.f32 %v1519_v46  ;;  %v1520_v56 = vmul.f32 -1.442695, %v571_v61  ;;  %v567_v43 = vpop.f32.mrf.mxu1 }
  0xec   :  { %v527_v34 = vpop.f32.mrf.mxu0 }
  0xed   :  { %1608 = vpow2.f32 %v1520_v56  ;;  %v568_v47 = vpop.f32.mrf.mxu1 }
  0xee   :  { %1610 = vpow2.f32 %v1521_v57 }
  0xf8   :  { %v1607_v14 = vpop.eup %1606 }
  0xf9   :  { %v583_v45 = vadd.f32 1.0, %v1607_v14 }
  0xfa   :  { %v1609_v44 = vpop.eup %1608 }
  0xfb   :  { %1612 = vrcp.f32 %v583_v45  ;;  %v584_v41 = vadd.f32 1.0, %v1609_v44  ;;  %v1611_v34 = vpop.eup %1610 }
  0xfc   :  { %1614 = vtanh.f32 %v573_v0  ;;  %v585_v42 = vadd.f32 1.0, %v1611_v34 }
  0xfd   :  { %1616 = vrcp.f32 %v584_v41 }
  0xfe   :  { %1618 = vrcp.f32 %v585_v42 }
 0x108   :  { %v1613_v43 = vpop.eup %1612 }
 0x109   :  { %v1615_v61 = vpop.eup %1614 }
 0x10a   :  { %v1617_v56 = vpop.eup %1616  ;;  %v594_v1 = vmul.f32 %v1615_v61, %v1613_v43 }
 0x10b   :  { %v593_v48 = vmul.f32 0.0, %v1617_v56  ;;  %v1619_v52 = vpop.eup %1618 }
 0x10d   :  { %v2170_v49 = vadd.f32 %v594_v1, %v593_v48 }
 0x10f   :  { %1620 = vtanh.f32 %v2170_v49 }
 0x11c   :  { %v1621_v54 = vpop.eup %1620 }
 0x11d   :  { %v597_v46 = vmul.f32 %v1621_v54, %v1619_v52 }
 0x11f   :  { %v611_v55 = vpack.c.bf16 %v597_v46, %v597_v46  ;;  %v604_v47 = vmul.f32 %v2176_v50, %v597_v46 }
 0x121   :  { %645 = vmatmul.mubr.bf16.vlgmr.msra.gmra.mxu0 %v611_v55  ;;  %686 = vmatmul.mubr.bf16.vlgmr.msra.gmra.mxu1 %v611_v55 }
 0x122   :  { %605 = vadd.xlane.f32.xlu0 %v604_v47  ;;  %731 = vmatpush1.bf16.msra.mxu0 %v1837_v8 }
 0x123   :  { %772 = vmatpush1.bf16.msra.mxu1 %v1843_v9  ;;  %732 = vmatprep.subr.bf16.mxu0 %v1850_v10 }
 0x124   :  { %773 = vmatprep.subr.bf16.mxu1 %v1857_v11  ;;  %762 = vmatprep.mubr.bf16.mxu0 %v2616_v53 }
 0x125   :  { %803 = vmatprep.mubr.bf16.mxu1 %v2616_v53 }
 0x126   :  { %733 = vmatpush1.bf16.msra.mxu0 %v1862_v12 }
 0x127   :  { %774 = vmatpush1.bf16.msra.mxu1 %v1867_v13  ;;  %734 = vmatprep.subr.bf16.mxu0 %v1879_v15 }
 0x128   :  { %775 = vmatprep.subr.bf16.mxu1 %v1885_v16 }
 0x12a   :  { %735 = vmatpush1.bf16.msra.mxu0 %v1891_v17 }
 0x12b   :  { %776 = vmatpush1.bf16.msra.mxu1 %v1896_v18  ;;  %736 = vmatprep.subr.bf16.mxu0 %v1903_v19 }
 0x12c   :  { %777 = vmatprep.subr.bf16.mxu1 %v1909_v20 }
 0x12e   :  { %737 = vmatpush1.bf16.msra.mxu0 %v1916_v21 }
 0x12f   :  { %778 = vmatpush1.bf16.msra.mxu1 %v1922_v22  ;;  %738 = vmatprep.subr.bf16.mxu0 %v1930_v23 }
 0x130   :  { %779 = vmatprep.subr.bf16.mxu1 %v1937_v24 }
 0x132   :  { %739 = vmatpush1.bf16.msra.mxu0 %v1946_v26 }
 0x133   :  { %780 = vmatpush1.bf16.msra.mxu1 %v1953_v27  ;;  %740 = vmatprep.subr.bf16.mxu0 %v1958_v28 }
 0x134   :  { %781 = vmatprep.subr.bf16.mxu1 %v1964_v29 }
 0x136   :  { %741 = vmatpush1.bf16.msra.mxu0 %v1972_v30 }
 0x137   :  { %782 = vmatpush1.bf16.msra.mxu1 %v1977_v31  ;;  %742 = vmatprep.subr.bf16.mxu0 %v1985_v32 }
 0x138   :  { %783 = vmatprep.subr.bf16.mxu1 %v1992_v33 }
 0x13a   :  { %743 = vmatpush1.bf16.msra.mxu0 %v2001_v35 }
 0x13b   :  { %784 = vmatpush1.bf16.msra.mxu1 %v2008_v36  ;;  %744 = vmatprep.subr.bf16.mxu0 %v2013_v37 }
 0x13c   :  { %785 = vmatprep.subr.bf16.mxu1 %v2019_v38 }
 0x13e   :  { %745 = vmatpush1.bf16.msra.mxu0 %v2027_v39 }
 0x13f   :  { %786 = vmatpush1.bf16.msra.mxu1 %v2035_v40  ;;  %848 = vmatprep.subr.bf16.mxu0 %v1827_v6 }
 0x140   :  { %889 = vmatprep.subr.bf16.mxu1 %v1832_v7 }
 0x1e1   :  { %v646_v60 = vpop.f32.mrf.mxu0  ;;  %v687_v51 = vpop.f32.mrf.mxu1 }
 0x1e2   :  { %v694_v57 = vadd.f32 %v646_v60, %v2094_v58  ;;  %v696_v42 = vadd.f32 %v687_v51, %v2097_v59 }
 0x1e3   :  { %v648_v14 = vpop.f32.mrf.mxu0  ;;  %v689_v0 = vpop.f32.mrf.mxu1 }
 0x1e4   :  { %v1523_v45 = vmul.f32 -1.442695, %v694_v57  ;;  %v695_v44 = vadd.f32 %v648_v14, %v2099_v62  ;;  %v1525_v48 = vmul.f32 -1.442695, %v696_v42  ;;  %v697_v1 = vadd.f32 %v689_v0, %v2102_v63 }
 0x1e5   :  { %v650_v41 = vpop.f32.mrf.mxu0  ;;  %v691_v34 = vpop.f32.mrf.mxu1 }
 0x1e6   :  { %1622 = vpow2.f32 %v1523_v45  ;;  %v1524_v43 = vmul.f32 -1.442695, %v695_v44 }
 0x1e7   :  { %v651_v61 = vpop.f32.mrf.mxu0  ;;  %v692_v56 = vpop.f32.mrf.mxu1 }
 0x1e8   :  { %1624 = vpow2.f32 %v1524_v43 }
 0x1e9   :  { %1626 = vpow2.f32 %v1525_v48 }
 0x1ea   :  { %1628 = vtanh.f32 %v697_v1 }
 0x1f3   :  { %v1623_v52 = vpop.eup %1622 }
 0x1f4   :  { %v707_v54 = vadd.f32 1.0, %v1623_v52 }
 0x1f5   :  { %v1625_v58 = vpop.eup %1624 }
 0x1f6   :  { %1630 = vrcp.f32 %v707_v54  ;;  %v708_v46 = vadd.f32 1.0, %v1625_v58  ;;  %v1627_v62 = vpop.eup %1626 }
 0x1f7   :  { %v1629_v55 = vpop.eup %1628  ;;  %v709_v14 = vadd.f32 1.0, %v1627_v62 }
 0x1f8   :  { %1632 = vrcp.f32 %v708_v46 }
 0x1f9   :  { %1634 = vrcp.f32 %v709_v14 }
 0x203   :  { %v1631_v47 = vpop.eup %1630 }
 0x204   :  { %v718_v60 = vmul.f32 %v1631_v47, %v1629_v55  ;;  %v2617_v47 = vld [vmem:[#allocation4_spill] sm:$0xff] }
 0x205   :  { %v1633_v57 = vpop.eup %1632 }
 0x206   :  { %v717_v45 = vmul.f32 %v1633_v57, %v2170_v49  ;;  %v1635_v63 = vpop.eup %1634 }
 0x208   :  { %v2218_v59 = vadd.f32 %v718_v60, %v717_v45 }
 0x20a   :  { %1636 = vtanh.f32 %v2218_v59 }
 0x217   :  { %v1637_v51 = vpop.eup %1636 }
 0x218   :  { %v721_v0 = vmul.f32 %v1637_v51, %v1635_v63 }
 0x21a   :  { %v729_v44 = vpack.c.bf16 %v721_v0, %v721_v0  ;;  %v722_v41 = vmul.f32 %v2176_v50, %v721_v0 }
 0x21c   :  { %763 = vmatmul.mubr.bf16.vlgmr.msra.gmra.mxu0 %v729_v44  ;;  %804 = vmatmul.mubr.bf16.vlgmr.msra.gmra.mxu1 %v729_v44 }
 0x21d   :  { %723 = vadd.xlane.f32.xlu0 %v722_v41  ;;  %849 = vmatpush1.bf16.msra.mxu0 %v1837_v8 }
 0x21e   :  { %890 = vmatpush1.bf16.msra.mxu1 %v1843_v9  ;;  %850 = vmatprep.subr.bf16.mxu0 %v1850_v10 }
 0x21f   :  { %891 = vmatprep.subr.bf16.mxu1 %v1857_v11  ;;  %880 = vmatprep.mubr.bf16.mxu0 %v2616_v53 }
 0x220   :  { %921 = vmatprep.mubr.bf16.mxu1 %v2616_v53 }
 0x221   :  { %851 = vmatpush1.bf16.msra.mxu0 %v1862_v12 }
 0x222   :  { %892 = vmatpush1.bf16.msra.mxu1 %v1867_v13  ;;  %852 = vmatprep.subr.bf16.mxu0 %v1879_v15 }
 0x223   :  { %893 = vmatprep.subr.bf16.mxu1 %v1885_v16 }
 0x225   :  { %853 = vmatpush1.bf16.msra.mxu0 %v1891_v17 }
 0x226   :  { %894 = vmatpush1.bf16.msra.mxu1 %v1896_v18  ;;  %854 = vmatprep.subr.bf16.mxu0 %v1903_v19 }
 0x227   :  { %895 = vmatprep.subr.bf16.mxu1 %v1909_v20 }
 0x229   :  { %855 = vmatpush1.bf16.msra.mxu0 %v1916_v21 }
 0x22a   :  { %896 = vmatpush1.bf16.msra.mxu1 %v1922_v22  ;;  %856 = vmatprep.subr.bf16.mxu0 %v1930_v23 }
 0x22b   :  { %897 = vmatprep.subr.bf16.mxu1 %v1937_v24 }
 0x22d   :  { %857 = vmatpush1.bf16.msra.mxu0 %v1946_v26 }
 0x22e   :  { %898 = vmatpush1.bf16.msra.mxu1 %v1953_v27  ;;  %858 = vmatprep.subr.bf16.mxu0 %v1958_v28 }
 0x22f   :  { %899 = vmatprep.subr.bf16.mxu1 %v1964_v29 }
 0x231   :  { %859 = vmatpush1.bf16.msra.mxu0 %v1972_v30 }
 0x232   :  { %900 = vmatpush1.bf16.msra.mxu1 %v1977_v31  ;;  %860 = vmatprep.subr.bf16.mxu0 %v1985_v32 }
 0x233   :  { %901 = vmatprep.subr.bf16.mxu1 %v1992_v33 }
 0x235   :  { %861 = vmatpush1.bf16.msra.mxu0 %v2001_v35 }
 0x236   :  { %902 = vmatpush1.bf16.msra.mxu1 %v2008_v36  ;;  %862 = vmatprep.subr.bf16.mxu0 %v2013_v37 }
 0x237   :  { %903 = vmatprep.subr.bf16.mxu1 %v2019_v38 }
 0x239   :  { %863 = vmatpush1.bf16.msra.mxu0 %v2027_v39 }
 0x23a   :  { %904 = vmatpush1.bf16.msra.mxu1 %v2035_v40  ;;  %966 = vmatprep.subr.bf16.mxu0 %v1827_v6 }
 0x23b   :  { %1007 = vmatprep.subr.bf16.mxu1 %v1832_v7 }
 0x2dc   :  { %v764_v49 = vpop.f32.mrf.mxu0  ;;  %v805_v34 = vpop.f32.mrf.mxu1 }
 0x2dd   :  { %v812_v43 = vadd.f32 %v764_v49, %v2104_v3  ;;  %v814_v62 = vadd.f32 %v805_v34, %v2107_v4 }
 0x2de   :  { %v766_v61 = vpop.f32.mrf.mxu0  ;;  %v807_v56 = vpop.f32.mrf.mxu1 }
 0x2df   :  { %v1526_v42 = vmul.f32 -1.442695, %v812_v43  ;;  %v813_v48 = vadd.f32 %v766_v61, %v2109_v25  ;;  %v1528_v55 = vmul.f32 -1.442695, %v814_v62  ;;  %v815_v60 = vadd.f32 %v807_v56, %v2617_v47  ;;  %v2619_v62 = vld [vmem:[#allocation7_spill] sm:$0xff] }
 0x2e0   :  { %v768_v1 = vpop.f32.mrf.mxu0  ;;  %v809_v52 = vpop.f32.mrf.mxu1 }
 0x2e1   :  { %1638 = vpow2.f32 %v1526_v42  ;;  %v1527_v54 = vmul.f32 -1.442695, %v813_v48  ;;  %v2618_v1 = vld [vmem:[#allocation5_spill] sm:$0xff] }
 0x2e2   :  { %v769_v58 = vpop.f32.mrf.mxu0  ;;  %v810_v46 = vpop.f32.mrf.mxu1 }
 0x2e3   :  { %1640 = vpow2.f32 %v1527_v54 }
 0x2e4   :  { %1642 = vpow2.f32 %v1528_v55 }
 0x2e5   :  { %1644 = vtanh.f32 %v815_v60 }
 0x2ee   :  { %v1639_v57 = vpop.eup %1638 }
 0x2ef   :  { %v825_v14 = vadd.f32 1.0, %v1639_v57 }
 0x2f0   :  { %v1641_v3 = vpop.eup %1640 }
 0x2f1   :  { %1646 = vrcp.f32 %v825_v14  ;;  %v826_v45 = vadd.f32 1.0, %v1641_v3  ;;  %v1643_v25 = vpop.eup %1642 }
 0x2f2   :  { %v1645_v63 = vpop.eup %1644  ;;  %v827_v41 = vadd.f32 1.0, %v1643_v25 }
 0x2f3   :  { %1648 = vrcp.f32 %v826_v45  ;;  %v2620_v45 = vld [vmem:[#allocation6_spill] sm:$0xff] }
 0x2f4   :  { %1650 = vrcp.f32 %v827_v41 }
 0x2fe   :  { %v1647_v51 = vpop.eup %1646 }
 0x2ff   :  { %v836_v0 = vmul.f32 %v1647_v51, %v1645_v63 }
 0x300   :  { %v1649_v44 = vpop.eup %1648 }
 0x301   :  { %v835_v49 = vmul.f32 %v1649_v44, %v2218_v59  ;;  %v1651_v34 = vpop.eup %1650 }
 0x303   :  { %v2261_v4 = vadd.f32 %v836_v0, %v835_v49 }
 0x305   :  { %1652 = vtanh.f32 %v2261_v4 }
 0x312   :  { %v1653_v43 = vpop.eup %1652 }
 0x313   :  { %v839_v61 = vmul.f32 %v1653_v43, %v1651_v34 }
 0x315   :  { %v847_v56 = vpack.c.bf16 %v839_v61, %v839_v61  ;;  %v840_v42 = vmul.f32 %v2176_v50, %v839_v61 }
 0x317   :  { %881 = vmatmul.mubr.bf16.vlgmr.msra.gmra.mxu0 %v847_v56  ;;  %922 = vmatmul.mubr.bf16.vlgmr.msra.gmra.mxu1 %v847_v56 }
 0x318   :  { %841 = vadd.xlane.f32.xlu1 %v840_v42  ;;  %967 = vmatpush1.bf16.msra.mxu0 %v1837_v8 }
 0x319   :  { %1008 = vmatpush1.bf16.msra.mxu1 %v1843_v9  ;;  %968 = vmatprep.subr.bf16.mxu0 %v1850_v10 }
 0x31a   :  { %1009 = vmatprep.subr.bf16.mxu1 %v1857_v11  ;;  %998 = vmatprep.mubr.bf16.mxu0 %v2616_v53 }
 0x31b   :  { %1039 = vmatprep.mubr.bf16.mxu1 %v2616_v53 }
 0x31c   :  { %969 = vmatpush1.bf16.msra.mxu0 %v1862_v12 }
 0x31d   :  { %1010 = vmatpush1.bf16.msra.mxu1 %v1867_v13  ;;  %970 = vmatprep.subr.bf16.mxu0 %v1879_v15 }
 0x31e   :  { %1011 = vmatprep.subr.bf16.mxu1 %v1885_v16 }
 0x320   :  { %971 = vmatpush1.bf16.msra.mxu0 %v1891_v17 }
 0x321   :  { %1012 = vmatpush1.bf16.msra.mxu1 %v1896_v18  ;;  %972 = vmatprep.subr.bf16.mxu0 %v1903_v19 }
 0x322   :  { %1013 = vmatprep.subr.bf16.mxu1 %v1909_v20 }
 0x324   :  { %973 = vmatpush1.bf16.msra.mxu0 %v1916_v21 }
 0x325   :  { %1014 = vmatpush1.bf16.msra.mxu1 %v1922_v22  ;;  %974 = vmatprep.subr.bf16.mxu0 %v1930_v23 }
 0x326   :  { %1015 = vmatprep.subr.bf16.mxu1 %v1937_v24 }
 0x328   :  { %975 = vmatpush1.bf16.msra.mxu0 %v1946_v26 }
 0x329   :  { %1016 = vmatpush1.bf16.msra.mxu1 %v1953_v27  ;;  %976 = vmatprep.subr.bf16.mxu0 %v1958_v28 }
 0x32a   :  { %1017 = vmatprep.subr.bf16.mxu1 %v1964_v29 }
 0x32c   :  { %977 = vmatpush1.bf16.msra.mxu0 %v1972_v30 }
 0x32d   :  { %1018 = vmatpush1.bf16.msra.mxu1 %v1977_v31  ;;  %978 = vmatprep.subr.bf16.mxu0 %v1985_v32 }
 0x32e   :  { %1019 = vmatprep.subr.bf16.mxu1 %v1992_v33 }
 0x330   :  { %979 = vmatpush1.bf16.msra.mxu0 %v2001_v35 }
 0x331   :  { %1020 = vmatpush1.bf16.msra.mxu1 %v2008_v36  ;;  %980 = vmatprep.subr.bf16.mxu0 %v2013_v37 }
 0x332   :  { %1021 = vmatprep.subr.bf16.mxu1 %v2019_v38 }
 0x334   :  { %981 = vmatpush1.bf16.msra.mxu0 %v2027_v39 }
 0x335   :  { %1022 = vmatpush1.bf16.msra.mxu1 %v2035_v40  ;;  %1084 = vmatprep.subr.bf16.mxu0 %v1827_v6 }
 0x336   :  { %1125 = vmatprep.subr.bf16.mxu1 %v1832_v7  ;;  %v2621_v7 = vld [vmem:[#allocation8_spill] sm:$0xff] }
 0x3d7   :  { %v882_v59 = vpop.f32.mrf.mxu0  ;;  %v923_v48 = vpop.f32.mrf.mxu1 }
 0x3d8   :  { %v930_v52 = vadd.f32 %v882_v59, %v2618_v1  ;;  %v932_v6 = vadd.f32 %v923_v48, %v2620_v45 }
 0x3d9   :  { %v884_v54 = vpop.f32.mrf.mxu0  ;;  %v925_v58 = vpop.f32.mrf.mxu1 }
 0x3da   :  { %v1529_v46 = vmul.f32 -1.442695, %v930_v52  ;;  %v931_v55 = vadd.f32 %v884_v54, %v2619_v62  ;;  %v1531_v25 = vmul.f32 -1.442695, %v932_v6  ;;  %v933_v63 = vadd.f32 %v925_v58, %v2621_v7 }
 0x3db   :  { %v886_v47 = vpop.f32.mrf.mxu0  ;;  %v927_v60 = vpop.f32.mrf.mxu1 }
 0x3dc   :  { %1654 = vpow2.f32 %v1529_v46  ;;  %v1530_v57 = vmul.f32 -1.442695, %v931_v55 }
 0x3dd   :  { %v887_v14 = vpop.f32.mrf.mxu0  ;;  %v928_v3 = vpop.f32.mrf.mxu1 }
 0x3de   :  { %1656 = vpow2.f32 %v1530_v57 }
 0x3df   :  { %1658 = vpow2.f32 %v1531_v25 }
 0x3e0   :  { %1660 = vtanh.f32 %v933_v63 }
 0x3e9   :  { %v1655_v51 = vpop.eup %1654 }
 0x3ea   :  { %v943_v0 = vadd.f32 1.0, %v1655_v51  ;;  %v2364_v51 = vld [vmem:[%s2590_s2 + $0xe0] ss:$16 sps:$4 sm:$0xff]  }
 0x3eb   :  { %v1657_v44 = vpop.eup %1656 }
 0x3ec   :  { %1662 = vrcp.f32 %v943_v0  ;;  %v944_v41 = vadd.f32 1.0, %v1657_v44  ;;  %v1659_v49 = vpop.eup %1658  ;;  %v2370_v0 = vld [vmem:[%s2590_s2 + $0xe8] ss:$16 sps:$4 sm:$0xff]   ;;  %v2376_v44 = vld [vmem:[%s2590_s2 + $0xc4] ss:$16 sps:$4 sm:$0xff]  }
 0x3ed   :  { %v1661_v34 = vpop.eup %1660  ;;  %v945_v42 = vadd.f32 1.0, %v1659_v49  ;;  %v2390_v49 = vld [vmem:[%s2590_s2 + $0xc0] ss:$16 sps:$4 sm:$0xff]  }
 0x3ee   :  { %1664 = vrcp.f32 %v944_v41  ;;  %v2382_v41 = vld [vmem:[%s2590_s2 + $0xcc] ss:$16 sps:$4 sm:$0xff]  }
 0x3ef   :  { %1666 = vrcp.f32 %v945_v42  ;;  %v2420_v42 = vld [vmem:[%s2590_s2 + $0xa8] ss:$16 sps:$4 sm:$0xff]  }
 0x3f9   :  { %v1663_v43 = vpop.eup %1662 }
 0x3fa   :  { %v954_v61 = vmul.f32 %v1663_v43, %v1661_v34  ;;  %v2396_v34 = vld [vmem:[%s2590_s2 + $0xc8] ss:$16 sps:$4 sm:$0xff]   ;;  %v2402_v43 = vld [vmem:[%s2590_s2 + $0xa4] ss:$16 sps:$4 sm:$0xff]  }
 0x3fb   :  { %v1665_v56 = vpop.eup %1664 }
 0x3fc   :  { %v953_v59 = vmul.f32 %v1665_v56, %v2261_v4  ;;  %v1667_v1 = vpop.eup %1666  ;;  %v2414_v56 = vld [vmem:[%s2590_s2 + $0xa0] ss:$16 sps:$4 sm:$0xff]  }
 0x3fe   :  { %v2304_v48 = vadd.f32 %v954_v61, %v953_v59  ;;  %v2408_v61 = vld [vmem:[%s2590_s2 + $0xac] ss:$16 sps:$4 sm:$0xff]   ;;  %v2426_v59 = vld [vmem:[%s2590_s2 + $0x84] ss:$16 sps:$4 sm:$0xff]  }
 0x400   :  { %1668 = vtanh.f32 %v2304_v48 }
 0x40d   :  { %v1669_v52 = vpop.eup %1668 }
 0x40e   :  { %v957_v54 = vmul.f32 %v1669_v52, %v1667_v1  ;;  %v2438_v1 = vld [vmem:[%s2590_s2 + $0x80] ss:$16 sps:$4 sm:$0xff]   ;;  %v2444_v52 = vld [vmem:[%s2590_s2 + $0x88] ss:$16 sps:$4 sm:$0xff]  }
 0x410   :  { %v965_v58 = vpack.c.bf16 %v957_v54, %v957_v54  ;;  %v958_v46 = vmul.f32 %v2176_v50, %v957_v54  ;;  %v2450_v54 = vld [vmem:[%s2590_s2 + $0x64] ss:$16 sps:$4 sm:$0xff]  }
 0x412   :  { %999 = vmatmul.mubr.bf16.vlgmr.msra.gmra.mxu0 %v965_v58  ;;  %1040 = vmatmul.mubr.bf16.vlgmr.msra.gmra.mxu1 %v965_v58  ;;  %v2456_v58 = vld [vmem:[%s2590_s2 + $0x6c] ss:$16 sps:$4 sm:$0xff]  }
 0x413   :  { %959 = vadd.xlane.f32.xlu1 %v958_v46  ;;  %1085 = vmatpush1.bf16.msra.mxu0 %v1837_v8  ;;  %v2343_v8 = vld [vmem:[%s2590_s2 + $0xe4] ss:$16 sps:$4 sm:$0xff]   ;;  %v2462_v46 = vld [vmem:[%s2590_s2 + $0x60] ss:$16 sps:$4 sm:$0xff]  }
 0x414   :  { %1126 = vmatpush1.bf16.msra.mxu1 %v1843_v9  ;;  %1086 = vmatprep.subr.bf16.mxu0 %v1850_v10  ;;  %v2349_v9 = vld [vmem:[%s2590_s2 + $0xec] ss:$16 sps:$4 sm:$0xff]  }
 0x415   :  { %1127 = vmatprep.subr.bf16.mxu1 %v1857_v11  ;;  %1116 = vmatprep.mubr.bf16.mxu0 %v2616_v53 }
 0x416   :  { %1157 = vmatprep.mubr.bf16.mxu1 %v2616_v53 }
 0x417   :  { %1087 = vmatpush1.bf16.msra.mxu0 %v1862_v12  ;;  %v2622_v12 = vld [vmem:[#allocation9_spill] sm:$0xff] }
 0x418   :  { %1128 = vmatpush1.bf16.msra.mxu1 %v1867_v13  ;;  %1088 = vmatprep.subr.bf16.mxu0 %v1879_v15 }
 0x419   :  { %1129 = vmatprep.subr.bf16.mxu1 %v1885_v16 }
 0x41b   :  { %1089 = vmatpush1.bf16.msra.mxu0 %v1891_v17 }
 0x41c   :  { %1130 = vmatpush1.bf16.msra.mxu1 %v1896_v18  ;;  %1090 = vmatprep.subr.bf16.mxu0 %v1903_v19  ;;  %v2623_v18 = vld [vmem:[#allocation11_spill] sm:$0xff] }
 0x41d   :  { %1131 = vmatprep.subr.bf16.mxu1 %v1909_v20 }
 0x41f   :  { %1091 = vmatpush1.bf16.msra.mxu0 %v1916_v21 }
 0x420   :  { %1132 = vmatpush1.bf16.msra.mxu1 %v1922_v22  ;;  %1092 = vmatprep.subr.bf16.mxu0 %v1930_v23 }
 0x421   :  { %1133 = vmatprep.subr.bf16.mxu1 %v1937_v24 }
 0x423   :  { %1093 = vmatpush1.bf16.msra.mxu0 %v1946_v26  ;;  %v2624_v26 = vld [vmem:[#allocation10_spill] sm:$0xff] }
 0x424   :  { %1134 = vmatpush1.bf16.msra.mxu1 %v1953_v27  ;;  %1094 = vmatprep.subr.bf16.mxu0 %v1958_v28 }
 0x425   :  { %1135 = vmatprep.subr.bf16.mxu1 %v1964_v29  ;;  %v2625_v29 = vld [vmem:[#allocation12_spill] sm:$0xff] }
 0x427   :  { %1095 = vmatpush1.bf16.msra.mxu0 %v1972_v30 }
 0x428   :  { %1136 = vmatpush1.bf16.msra.mxu1 %v1977_v31  ;;  %1096 = vmatprep.subr.bf16.mxu0 %v1985_v32 }
 0x429   :  { %1137 = vmatprep.subr.bf16.mxu1 %v1992_v33 }
 0x42b   :  { %1097 = vmatpush1.bf16.msra.mxu0 %v2001_v35 }
 0x42c   :  { %1138 = vmatpush1.bf16.msra.mxu1 %v2008_v36  ;;  %1098 = vmatprep.subr.bf16.mxu0 %v2013_v37 }
 0x42d   :  { %1139 = vmatprep.subr.bf16.mxu1 %v2019_v38 }
 0x42f   :  { %1099 = vmatpush1.bf16.msra.mxu0 %v2027_v39 }
 0x430   :  { %1140 = vmatpush1.bf16.msra.mxu1 %v2035_v40  ;;  %1202 = vmatprep.subr.bf16.mxu0 %v2343_v8 }
 0x431   :  { %1243 = vmatprep.subr.bf16.mxu1 %v2349_v9 }
 0x4d2   :  { %v1000_v10 = vpop.f32.mrf.mxu0  ;;  %v1041_v11 = vpop.f32.mrf.mxu1 }
 0x4d3   :  { %v1048_v13 = vadd.f32 %v1000_v10, %v2622_v12  ;;  %v1050_v27 = vadd.f32 %v1041_v11, %v2624_v26  ;;  %v2468_v10 = vld [vmem:[%s2590_s2 + $0x68] ss:$16 sps:$4 sm:$0xff]   ;;  %v2474_v11 = vld [vmem:[%s2590_s2 + $0x44] ss:$16 sps:$4 sm:$0xff]   ;;  %v2480_v12 = vld [vmem:[%s2590_s2 + $0x4c] ss:$16 sps:$4 sm:$0xff]  }
 0x4d4   :  { %v1002_v15 = vpop.f32.mrf.mxu0  ;;  %v1043_v16 = vpop.f32.mrf.mxu1 }
 0x4d5   :  { %v1532_v17 = vmul.f32 -1.442695, %v1048_v13  ;;  %v1049_v19 = vadd.f32 %v1002_v15, %v2623_v18  ;;  %v1534_v28 = vmul.f32 -1.442695, %v1050_v27  ;;  %v1051_v30 = vadd.f32 %v1043_v16, %v2625_v29  ;;  %v2486_v13 = vld [vmem:[%s2590_s2 + $0x40] ss:$16 sps:$4 sm:$0xff]  }
 0x4d6   :  { %v1004_v20 = vpop.f32.mrf.mxu0  ;;  %v1045_v21 = vpop.f32.mrf.mxu1  ;;  %v2492_v15 = vld [vmem:[%s2590_s2 + $0x48] ss:$16 sps:$4 sm:$0xff]   ;;  %v2498_v16 = vld [vmem:[%s2590_s2 + $0x24] ss:$16 sps:$4 sm:$0xff]   ;;  %v2510_v18 = vld [vmem:[%s2590_s2 + $0x20] ss:$16 sps:$4 sm:$0xff]  }
 0x4d7   :  { %1670 = vpow2.f32 %v1532_v17  ;;  %v1533_v22 = vmul.f32 -1.442695, %v1049_v19  ;;  %v2504_v17 = vld [vmem:[%s2590_s2 + $0x2c] ss:$16 sps:$4 sm:$0xff]  }
 0x4d8   :  { %v1005_v23 = vpop.f32.mrf.mxu0  ;;  %v1046_v24 = vpop.f32.mrf.mxu1  ;;  %v2626_v21 = vld [vmem:[#allocation13_spill] sm:$0xff] }
 0x4d9   :  { %1672 = vpow2.f32 %v1533_v22 }
 0x4da   :  { %1674 = vpow2.f32 %v1534_v28 }
 0x4db   :  { %1676 = vtanh.f32 %v1051_v30 }
 0x4e4   :  { %v1671_v31 = vpop.eup %1670 }
 0x4e5   :  { %v1061_v32 = vadd.f32 1.0, %v1671_v31 }
 0x4e6   :  { %v1673_v33 = vpop.eup %1672 }
 0x4e7   :  { %1678 = vrcp.f32 %v1061_v32  ;;  %v1062_v35 = vadd.f32 1.0, %v1673_v33  ;;  %v1675_v4 = vpop.eup %1674 }
 0x4e8   :  { %v1677_v62 = vpop.eup %1676  ;;  %v1063_v57 = vadd.f32 1.0, %v1675_v4 }
 0x4e9   :  { %1680 = vrcp.f32 %v1062_v35 }
 0x4ea   :  { %1682 = vrcp.f32 %v1063_v57 }
 0x4f4   :  { %v1679_v55 = vpop.eup %1678 }
 0x4f5   :  { %v1072_v47 = vmul.f32 %v1679_v55, %v1677_v62 }
 0x4f6   :  { %v1681_v60 = vpop.eup %1680 }
 0x4f7   :  { %v1071_v14 = vmul.f32 %v1681_v60, %v2304_v48  ;;  %v1683_v45 = vpop.eup %1682  ;;  %v2432_v48 = vld [vmem:[%s2590_s2 + $0x8c] ss:$16 sps:$4 sm:$0xff]  }
 0x4f9   :  { %v2357_v3 = vadd.f32 %v1072_v47, %v1071_v14 }
 0x4fb   :  { %1684 = vtanh.f32 %v2357_v3 }
 0x508   :  { %v1685_v6 = vpop.eup %1684 }
 0x509   :  { %v1075_v25 = vmul.f32 %v1685_v6, %v1683_v45 }
 0x50b   :  { %v1083_v7 = vpack.c.bf16 %v1075_v25, %v1075_v25  ;;  %v1076_v63 = vmul.f32 %v2176_v50, %v1075_v25 }
 0x50d   :  { %1117 = vmatmul.mubr.bf16.vlgmr.msra.gmra.mxu0 %v1083_v7  ;;  %1158 = vmatmul.mubr.bf16.vlgmr.msra.gmra.mxu1 %v1083_v7 }
 0x50e   :  { %1077 = vadd.xlane.f32.xlu0 %v1076_v63  ;;  %1203 = vmatpush1.bf16.msra.mxu0 %v2364_v51 }
 0x50f   :  { %1244 = vmatpush1.bf16.msra.mxu1 %v2370_v0  ;;  %1204 = vmatprep.subr.bf16.mxu0 %v2376_v44 }
 0x510   :  { %1245 = vmatprep.subr.bf16.mxu1 %v2382_v41  ;;  %1234 = vmatprep.mubr.bf16.mxu0 %v2616_v53 }
 0x511   :  { %1275 = vmatprep.mubr.bf16.mxu1 %v2616_v53 }
 0x512   :  { %1205 = vmatpush1.bf16.msra.mxu0 %v2390_v49 }
 0x513   :  { %1246 = vmatpush1.bf16.msra.mxu1 %v2396_v34  ;;  %1206 = vmatprep.subr.bf16.mxu0 %v2402_v43 }
 0x514   :  { %1247 = vmatprep.subr.bf16.mxu1 %v2408_v61 }
 0x516   :  { %1207 = vmatpush1.bf16.msra.mxu0 %v2414_v56 }
 0x517   :  { %1248 = vmatpush1.bf16.msra.mxu1 %v2420_v42  ;;  %1208 = vmatprep.subr.bf16.mxu0 %v2426_v59 }
 0x518   :  { %1249 = vmatprep.subr.bf16.mxu1 %v2432_v48 }
 0x51a   :  { %1209 = vmatpush1.bf16.msra.mxu0 %v2438_v1 }
 0x51b   :  { %1250 = vmatpush1.bf16.msra.mxu1 %v2444_v52  ;;  %1210 = vmatprep.subr.bf16.mxu0 %v2450_v54 }
 0x51c   :  { %1251 = vmatprep.subr.bf16.mxu1 %v2456_v58 }
 0x51e   :  { %1211 = vmatpush1.bf16.msra.mxu0 %v2462_v46 }
 0x51f   :  { %1252 = vmatpush1.bf16.msra.mxu1 %v2468_v10  ;;  %1212 = vmatprep.subr.bf16.mxu0 %v2474_v11 }
 0x520   :  { %1253 = vmatprep.subr.bf16.mxu1 %v2480_v12 }
 0x522   :  { %1213 = vmatpush1.bf16.msra.mxu0 %v2486_v13 }
 0x523   :  { %1254 = vmatpush1.bf16.msra.mxu1 %v2492_v15  ;;  %1214 = vmatprep.subr.bf16.mxu0 %v2498_v16 }
 0x524   :  { %1255 = vmatprep.subr.bf16.mxu1 %v2504_v17 }
 0x526   :  { %1215 = vmatpush1.bf16.msra.mxu0 %v2510_v18 }
 0x527   :  { %1256 = vmatpush1.bf16.msra.mxu1 %v2008_v36  ;;  %1216 = vmatprep.subr.bf16.mxu0 %v2013_v37  ;;  %v2627_v36 = vld [vmem:[#allocation15_spill] sm:$0xff] }
 0x528   :  { %1257 = vmatprep.subr.bf16.mxu1 %v2019_v38 }
 0x52a   :  { %1217 = vmatpush1.bf16.msra.mxu0 %v2027_v39 }
 0x52b   :  { %1258 = vmatpush1.bf16.msra.mxu1 %v2035_v40  ;;  %1320 = vmatprep.subr.bf16.mxu0 %v2343_v8  ;;  %v2628_v40 = vld [vmem:[#allocation14_spill] sm:$0xff] }
 0x52c   :  { %1361 = vmatprep.subr.bf16.mxu1 %v2349_v9  ;;  %v2629_v9 = vld [vmem:[#allocation16_spill] sm:$0xff] }
 0x5cd   :  { %v1118_v19 = vpop.f32.mrf.mxu0  ;;  %v1159_v20 = vpop.f32.mrf.mxu1 }
 0x5ce   :  { %v1166_v22 = vadd.f32 %v1118_v19, %v2626_v21  ;;  %v1168_v8 = vadd.f32 %v1159_v20, %v2628_v40 }
 0x5cf   :  { %v1120_v23 = vpop.f32.mrf.mxu0  ;;  %v1161_v24 = vpop.f32.mrf.mxu1 }
 0x5d0   :  { %v1535_v26 = vmul.f32 -1.442695, %v1166_v22  ;;  %v1167_v27 = vadd.f32 %v1120_v23, %v2627_v36  ;;  %v1537_v30 = vmul.f32 -1.442695, %v1168_v8  ;;  %v1169_v31 = vadd.f32 %v1161_v24, %v2629_v9 }
 0x5d1   :  { %v1122_v37 = vpop.f32.mrf.mxu0  ;;  %v1163_v28 = vpop.f32.mrf.mxu1 }
 0x5d2   :  { %1686 = vpow2.f32 %v1535_v26  ;;  %v1536_v38 = vmul.f32 -1.442695, %v1167_v27 }
 0x5d3   :  { %v1123_v39 = vpop.f32.mrf.mxu0  ;;  %v1164_v29 = vpop.f32.mrf.mxu1 }
 0x5d4   :  { %1688 = vpow2.f32 %v1536_v38 }
 0x5d5   :  { %1690 = vpow2.f32 %v1537_v30  ;;  %v11_v30 = vstv %s2593_s5 }
 0x5d6   :  { %1692 = vtanh.f32 %v1169_v31  ;;  %12 = vst [vmem:[#allocation3] sm:$0x1] %v11_v30 }
 0x5dd   :  { %v1544_v9 = vld [vmem:[#allocation3] ss:$0 sm:$0xff] }
 0x5df   :  { %v1687_v32 = vpop.eup %1686 }
 0x5e0   :  { %v1179_v33 = vadd.f32 1.0, %v1687_v32 }
 0x5e1   :  { %v1689_v35 = vpop.eup %1688 }
 0x5e2   :  { %1694 = vrcp.f32 %v1179_v33  ;;  %v1180_v4 = vadd.f32 1.0, %v1689_v35  ;;  %v1691_v62 = vpop.eup %1690  ;;  %v2634_v33 = vld [vmem:[#allocation21_spill] sm:$0xff] }
 0x5e3   :  { %v1693_v55 = vpop.eup %1692  ;;  %v1181_v14 = vadd.f32 1.0, %v1691_v62 }
 0x5e4   :  { %1696 = vrcp.f32 %v1180_v4 }
 0x5e5   :  { %1698 = vrcp.f32 %v1181_v14 }
 0x5ef   :  { %v1695_v47 = vpop.eup %1694 }
 0x5f0   :  { %v1190_v60 = vmul.f32 %v1695_v47, %v1693_v55 }
 0x5f1   :  { %v1697_v57 = vpop.eup %1696 }
 0x5f2   :  { %v1189_v45 = vmul.f32 %v1697_v57, %v2357_v3  ;;  %v1699_v25 = vpop.eup %1698  ;;  %v1766_v3 = vld [vmem:[%s2590_s2 + $0x4] ss:$16 sps:$4 sm:$0xff]  }
 0x5f4   :  { %v2525_v6 = vadd.f32 %v1190_v60, %v1189_v45 }
 0x5f6   :  { %1700 = vtanh.f32 %v2525_v6 }
 0x603   :  { %v1701_v7 = vpop.eup %1700 }
 0x604   :  { %v1193_v63 = vmul.f32 %v1701_v7, %v1699_v25  ;;  %v2635_v25 = vld [vmem:[#allocation22_spill] sm:$0xff] }
 0x606   :  { %v1201_v19 = vpack.c.bf16 %v1193_v63, %v1193_v63  ;;  %v1194_v20 = vmul.f32 %v2176_v50, %v1193_v63 }
 0x608   :  { %1235 = vmatmul.mubr.bf16.vlgmr.msra.gmra.mxu0 %v1201_v19  ;;  %1276 = vmatmul.mubr.bf16.vlgmr.msra.gmra.mxu1 %v1201_v19 }
 0x609   :  { %1195 = vadd.xlane.f32.xlu1 %v1194_v20  ;;  %1321 = vmatpush1.bf16.msra.mxu0 %v2364_v51  ;;  %v1767_v51 = vld [vmem:[%s2590_s2 + $0xc] ss:$16 sps:$4 sm:$0xff]  }
 0x60a   :  { %1362 = vmatpush1.bf16.msra.mxu1 %v2370_v0  ;;  %1322 = vmatprep.subr.bf16.mxu0 %v2376_v44  ;;  %v1768_v0 = vld [vmem:[%s2590_s2] ss:$16 sps:$4 sm:$0xff]   ;;  %v1769_v44 = vld [vmem:[%s2590_s2 + $0x8] ss:$16 sps:$4 sm:$0xff]  }
 0x60b   :  { %1363 = vmatprep.subr.bf16.mxu1 %v2382_v41  ;;  %1352 = vmatprep.mubr.bf16.mxu0 %v2616_v53 }
 0x60c   :  { %1393 = vmatprep.mubr.bf16.mxu1 %v2616_v53  ;;  %v1765_v53 = vld [vmem:[%s2590_s2 + $0x28] ss:$16 sps:$4 sm:$0xff]  }
 0x60d   :  { %1323 = vmatpush1.bf16.msra.mxu0 %v2390_v49 }
 0x60e   :  { %1364 = vmatpush1.bf16.msra.mxu1 %v2396_v34  ;;  %1324 = vmatprep.subr.bf16.mxu0 %v2402_v43  ;;  %v2630_v34 = vld [vmem:[#allocation17_spill] sm:$0xff] }
 0x60f   :  { %1365 = vmatprep.subr.bf16.mxu1 %v2408_v61 }
 0x611   :  { %1325 = vmatpush1.bf16.msra.mxu0 %v2414_v56 }
 0x612   :  { %1366 = vmatpush1.bf16.msra.mxu1 %v2420_v42  ;;  %1326 = vmatprep.subr.bf16.mxu0 %v2426_v59  ;;  %v2631_v59 = vld [vmem:[#allocation19_spill] sm:$0xff] }
 0x613   :  { %1367 = vmatprep.subr.bf16.mxu1 %v2432_v48 }
 0x615   :  { %1327 = vmatpush1.bf16.msra.mxu0 %v2438_v1 }
 0x616   :  { %1368 = vmatpush1.bf16.msra.mxu1 %v2444_v52  ;;  %1328 = vmatprep.subr.bf16.mxu0 %v2450_v54 }
 0x617   :  { %1369 = vmatprep.subr.bf16.mxu1 %v2456_v58 }
 0x619   :  { %1329 = vmatpush1.bf16.msra.mxu0 %v2462_v46 }
 0x61a   :  { %1370 = vmatpush1.bf16.msra.mxu1 %v2468_v10  ;;  %1330 = vmatprep.subr.bf16.mxu0 %v2474_v11  ;;  %v2632_v10 = vld [vmem:[#allocation18_spill] sm:$0xff] }
 0x61b   :  { %1371 = vmatprep.subr.bf16.mxu1 %v2480_v12 }
 0x61d   :  { %1331 = vmatpush1.bf16.msra.mxu0 %v2486_v13  ;;  %v2633_v13 = vld [vmem:[#allocation20_spill] sm:$0xff] }
 0x61e   :  { %1372 = vmatpush1.bf16.msra.mxu1 %v2492_v15  ;;  %1332 = vmatprep.subr.bf16.mxu0 %v2498_v16 }
 0x61f   :  { %1373 = vmatprep.subr.bf16.mxu1 %v2504_v17 }
 0x621   :  { %1333 = vmatpush1.bf16.msra.mxu0 %v2510_v18 }
 0x622   :  { %1374 = vmatpush1.bf16.msra.mxu1 %v1765_v53  ;;  %1334 = vmatprep.subr.bf16.mxu0 %v1766_v3 }
 0x623   :  { %1375 = vmatprep.subr.bf16.mxu1 %v1767_v51 }
 0x625   :  { %1335 = vmatpush1.bf16.msra.mxu0 %v1768_v0 }
 0x626   :  { %1376 = vmatpush1.bf16.msra.mxu1 %v1769_v44 }
 0x6c8   :  { %v1236_v41 = vpop.f32.mrf.mxu0  ;;  %v1277_v49 = vpop.f32.mrf.mxu1 }
 0x6c9   :  { %v1284_v43 = vadd.f32 %v1236_v41, %v2630_v34  ;;  %v1286_v11 = vadd.f32 %v1277_v49, %v2632_v10 }
 0x6ca   :  { %v1238_v61 = vpop.f32.mrf.mxu0  ;;  %v1279_v56 = vpop.f32.mrf.mxu1 }
 0x6cb   :  { %v1538_v42 = vmul.f32 -1.442695, %v1284_v43  ;;  %v1285_v48 = vadd.f32 %v1238_v61, %v2631_v59  ;;  %v1540_v12 = vmul.f32 -1.442695, %v1286_v11  ;;  %v1287_v15 = vadd.f32 %v1279_v56, %v2633_v13 }
 0x6cc   :  { %v1240_v1 = vpop.f32.mrf.mxu0  ;;  %v1281_v52 = vpop.f32.mrf.mxu1 }
 0x6cd   :  { %1702 = vpow2.f32 %v1538_v42  ;;  %v1539_v54 = vmul.f32 -1.442695, %v1285_v48  ;;  %v606_v48 = vpop.xlane.xlu0 %605  ;;  %v842_v52 = vpop.xlane.xlu1 %841 }
 0x6ce   :  { %v1241_v58 = vpop.f32.mrf.mxu0  ;;  %v1282_v46 = vpop.f32.mrf.mxu1 }
 0x6cf   :  { %1704 = vpow2.f32 %v1539_v54 }
 0x6d0   :  { %1706 = vpow2.f32 %v1540_v12 }
 0x6d1   :  { %1708 = vtanh.f32 %v1287_v15  ;;  %v724_v1 = vpop.xlane.xlu0 %723  ;;  %v960_v58 = vpop.xlane.xlu1 %959 }
 0x6d2   :  { %v1434_v46 = vsel %vm1433_vm1, %v606_v48, %v724_v1 }
 0x6d3   :  { %v1436_v11 = vsel %vm1435_vm2, %v1434_v46, %v842_v52 }
 0x6d4   :  { %v1438_v13 = vsel %vm1437_vm3, %v1436_v11, %v960_v58 }
 0x6d5   :  { %v1078_v54 = vpop.xlane.xlu0 %1077  ;;  %v1196_v12 = vpop.xlane.xlu1 %1195 }
 0x6d6   :  { %v1440_v15 = vsel %vm1439_vm4, %v1438_v13, %v1078_v54 }
 0x6da   :  { %v1703_v16 = vpop.eup %1702 }
 0x6db   :  { %v1297_v17 = vadd.f32 1.0, %v1703_v16 }
 0x6dc   :  { %v1705_v18 = vpop.eup %1704 }
 0x6dd   :  { %1710 = vrcp.f32 %v1297_v17  ;;  %v1298_v21 = vadd.f32 1.0, %v1705_v18  ;;  %v1707_v22 = vpop.eup %1706 }
 0x6de   :  { %v1709_v23 = vpop.eup %1708  ;;  %v1299_v27 = vadd.f32 1.0, %v1707_v22 }
 0x6df   :  { %1712 = vrcp.f32 %v1298_v21 }
 0x6e0   :  { %1714 = vrcp.f32 %v1299_v27 }
 0x6ea   :  { %v1711_v24 = vpop.eup %1710 }
 0x6eb   :  { %v1308_v26 = vmul.f32 %v1711_v24, %v1709_v23 }
 0x6ec   :  { %v1713_v36 = vpop.eup %1712 }
 0x6ed   :  { %v1307_v37 = vmul.f32 %v1713_v36, %v2525_v6  ;;  %v1715_v38 = vpop.eup %1714 }
 0x6ef   :  { %v1309_v28 = vadd.f32 %v1308_v26, %v1307_v37 }
 0x6f1   :  { %1716 = vtanh.f32 %v1309_v28 }
 0x6fe   :  { %v1717_v39 = vpop.eup %1716 }
 0x6ff   :  { %v1311_v29 = vmul.f32 %v1717_v39, %v1715_v38 }
 0x701   :  { %v1319_v40 = vpack.c.bf16 %v1311_v29, %v1311_v29  ;;  %v1312_v8 = vmul.f32 %v2176_v50, %v1311_v29 }
 0x703   :  { %1353 = vmatmul.mubr.bf16.vlgmr.msra.gmra.mxu0 %v1319_v40  ;;  %1394 = vmatmul.mubr.bf16.vlgmr.msra.gmra.mxu1 %v1319_v40 }
 0x704   :  { %1313 = vadd.xlane.f32.xlu0 %v1312_v8 }
 0x71a   :  { %1454 = vperm.xlu0 %1547, %v1544_v9  }
 0x78d   :  { %v1314_v10 = vpop.xlane.xlu0 %1313 }
 0x795   :  { %v1455_v16 = vpop.permute.xlu0 %1454 }
 0x7c3   :  { %v1354_v31 = vpop.f32.mrf.mxu0  ;;  %v1395_v32 = vpop.f32.mrf.mxu1 }
 0x7c4   :  { %v1402_v35 = vadd.f32 %v1354_v31, %v2634_v33  ;;  %v1404_v7 = vadd.f32 %v1395_v32, %v2635_v25 }
 0x7c5   :  { %v1356_v4 = vpop.f32.mrf.mxu0  ;;  %v1397_v62 = vpop.f32.mrf.mxu1 }
 0x7c6   :  { %v1541_v55 = vmul.f32 -1.442695, %v1402_v35  ;;  %v1403_v47 = vadd.f32 %v1356_v4, %v2160_v2  ;;  %v1543_v63 = vmul.f32 -1.442695, %v1404_v7  ;;  %v1405_v19 = vadd.f32 %v1397_v62, %v2163_v5 }
 0x7c7   :  { %v1358_v60 = vpop.f32.mrf.mxu0  ;;  %v1399_v57 = vpop.f32.mrf.mxu1 }
 0x7c8   :  { %1718 = vpow2.f32 %v1541_v55  ;;  %v1542_v14 = vmul.f32 -1.442695, %v1403_v47 }
 0x7c9   :  { %v1359_v45 = vpop.f32.mrf.mxu0  ;;  %v1400_v6 = vpop.f32.mrf.mxu1 }
 0x7ca   :  { %1720 = vpow2.f32 %v1542_v14 }
 0x7cb   :  { %1722 = vpow2.f32 %v1543_v63 }
 0x7cc   :  { %1724 = vtanh.f32 %v1405_v19 }
 0x7d5   :  { %v1719_v20 = vpop.eup %1718 }
 0x7d6   :  { %v1415_v53 = vadd.f32 1.0, %v1719_v20 }
 0x7d7   :  { %v1721_v3 = vpop.eup %1720 }
 0x7d8   :  { %1726 = vrcp.f32 %v1415_v53  ;;  %v1416_v51 = vadd.f32 1.0, %v1721_v3  ;;  %v1723_v2 = vpop.eup %1722 }
 0x7d9   :  { %v1725_v0 = vpop.eup %1724  ;;  %v1417_v34 = vadd.f32 1.0, %v1723_v2 }
 0x7da   :  { %1728 = vrcp.f32 %v1416_v51 }
 0x7db   :  { %1730 = vrcp.f32 %v1417_v34 }
 0x7e5   :  { %v1727_v44 = vpop.eup %1726 }
 0x7e6   :  { %v1426_v41 = vmul.f32 %v1727_v44, %v1725_v0 }
 0x7e7   :  { %v1729_v49 = vpop.eup %1728 }
 0x7e8   :  { %v1425_v43 = vmul.f32 %v1729_v49, %v1309_v28  ;;  %v1731_v56 = vpop.eup %1730 }
 0x7ea   :  { %v1427_v61 = vadd.f32 %v1426_v41, %v1425_v43 }
 0x7ec   :  { %1732 = vtanh.f32 %v1427_v61 }
 0x7f9   :  { %v1733_v5 = vpop.eup %1732 }
 0x7fa   :  { %v1429_v42 = vmul.f32 %v1733_v5, %v1731_v56 }
 0x7fc   :  { %v1430_v59 = vmul.f32 %v2176_v50, %v1429_v42  ;;  %v1442_v50 = vsel %vm1441_vm5, %v1440_v15, %v1196_v12 }
 0x7fd   :  { %v1444_v17 = vsel %vm1443_vm6, %v1442_v50, %v1314_v10 }
 0x7fe   :  { %1431 = vadd.xlane.f32.xlu1 %v1430_v59 }
 0x887   :  { %v1432_v18 = vpop.xlane.xlu1 %1431 }
 0x888   :  { %v1446_v21 = vsel %vm1445_vm7, %v1444_v17, %v1432_v18 }
 0x889   :  { %v1457_v22 = vadd.f32 %v1455_v16, %v1446_v21 }
 0x88b   :  { %v1545_v23 = vmul.f32 -1.442695, %v1457_v22 }
 0x88d   :  { %1734 = vpow2.f32 %v1545_v23 }
 0x89a   :  { %v1735_v24 = vpop.eup %1734 }
 0x89b   :  { %v1461_v26 = vadd.f32 1.0, %v1735_v24 }
 0x89d   :  { %1736 = vrcp.f32 %v1461_v26 }
 0x8aa   :  { %v1737_v36 = vpop.eup %1736 }
 0x8ab   :  { %v1465_v27 = vsel %vm1464_vm8, %v1737_v36, 0.0 }
 0x8ac   :  { %1466 = vst [vmem:[%s2594_s6] sm:$0xff] %v1465_v27 }

</bundles_post_ra>
